<compile_context>
chip_gen: v7x
topology: tpu7x:2x2x1
jax: 0.10.0
libtpu: 0.0.40
codegen_flags: <defaults>
</compile_context>

<pallas_src>
import math

import jax
import jax.numpy as jnp
from jax.experimental import pallas as pl
from jax.experimental.pallas import tpu as pltpu  # noqa: F401  (VMEM default memory space)


# ----------------------------- Fused encoder kernel -----------------------------
# Gate order follows PyTorch nn.GRU: r (reset), z (update), n (new), packed along lanes.
def encoder_kernel(src_ref,                       # [T*B, 1] int32
                   table_ref,                     # [V, E]   f32
                   wih_f_ref, whh_f_ref, b_f_ref, bhn_f_ref,
                   wih_b_ref, whh_b_ref, b_b_ref, bhn_b_ref,
                   wfc_ref, bfc_ref,
                   out_ref, hid_ref):
    T, B, _ = out_ref.shape
    H = whh_f_ref.shape[0]
    TB = src_ref.shape[0]
    V = table_ref.shape[0]

    # ---- Fused embedding lookup: one-hot(src) @ table on the MXU.
    # (one-hot rows are exactly 0.0 / 1.0, so this reproduces the gather exactly)
    src_col = src_ref[...]                                          # [T*B, 1] int32
    vocab_ids = jax.lax.broadcasted_iota(jnp.int32, (TB, V), 1)     # [T*B, V]
    onehot = jnp.where(src_col == vocab_ids, 1.0, 0.0)              # [T*B, V] f32
    emb = jnp.dot(onehot, table_ref[...],
                  preferred_element_type=jnp.float32)               # [T*B, E]

    # ---- Input projections hoisted off the serial recurrence:
    # one lane-packed batched matmul per direction (gates r|z|n along lanes, 3H = 96).
    gi_f = jnp.dot(emb, wih_f_ref[...],
                   preferred_element_type=jnp.float32) + b_f_ref[...]   # [T*B, 3H]
    gi_b = jnp.dot(emb, wih_b_ref[...],
                   preferred_element_type=jnp.float32) + b_b_ref[...]   # [T*B, 3H]

    whh_f = whh_f_ref[...]   # [H, 3H]
    bhn_f = bhn_f_ref[...]   # [1, H]  (b_hh_n, sits inside r * (W_hn h + b_hn))
    whh_b = whh_b_ref[...]
    bhn_b = bhn_b_ref[...]

    def gru_cell(gi, h, whh, bhn):
        # Only the hidden projection remains on the serial chain.
        gh = jnp.dot(h, whh, preferred_element_type=jnp.float32)    # [B, 3H]
        r = jax.nn.sigmoid(gi[:, 0:H] + gh[:, 0:H])
        z = jax.nn.sigmoid(gi[:, H:2 * H] + gh[:, H:2 * H])
        n = jnp.tanh(gi[:, 2 * H:3 * H] + r * (gh[:, 2 * H:3 * H] + bhn))
        return (1.0 - z) * n + z * h

    hf = jnp.zeros((B, H), jnp.float32)
    hb = jnp.zeros((B, H), jnp.float32)
    # Fully unrolled time loop (T static & small): the two independent recurrences
    # interleave within each iteration; all slices / stores are static and B=8 keeps the
    # per-step GI row slices aligned to whole 8-sublane vregs.
    for t in range(T):
        rt = T - 1 - t
        hf = gru_cell(gi_f[t * B:(t + 1) * B, :], hf, whh_f, bhn_f)
        hb = gru_cell(gi_b[rt * B:(rt + 1) * B, :], hb, whh_b, bhn_b)
        out_ref[t, :, 0:H] = hf            # forward half of outputs[t]
        out_ref[rt, :, H:2 * H] = hb       # backward half of outputs[rt]

    # ---- fc epilogue: hidden = tanh(cat(hf_final, hb_final) @ W_fc + b_fc), one matmul.
    hcat = jnp.concatenate([hf, hb], axis=-1)                       # [B, 2H]
    hid_ref[...] = jnp.tanh(
        jnp.dot(hcat, wfc_ref[...], preferred_element_type=jnp.float32) + bfc_ref[...])


# ----------------------------- One-time parameter prepacking -----------------------------
def prepack_encoder_params(params):
    """Pack GRU gate weights along lanes, pre-sum r/z biases, flatten fc weight.

    Done ONCE at parameter-setup time so the per-call path issues no XLA concat ops.
    """
    def pack(wih, whh, bih, bhh):
        wih_p = jnp.concatenate([wih[0], wih[1], wih[2]], axis=-1)                  # [E, 3H]
        whh_p = jnp.concatenate([whh[0], whh[1], whh[2]], axis=-1)                  # [H, 3H]
        b_p = jnp.concatenate([bih[0] + bhh[0], bih[1] + bhh[1], bih[2]], axis=-1)  # [1, 3H]
        return wih_p, whh_p, b_p, bhh[2]

    wih_f, whh_f, b_f, bhn_f = pack(params["wih_f"], params["whh_f"],
                                    params["bih_f"], params["bhh_f"])
    wih_b, whh_b, b_b, bhn_b = pack(params["wih_b"], params["whh_b"],
                                    params["bih_b"], params["bhh_b"])
    return {
        "embedding": params["embedding"].astype(jnp.float32),                       # [V, E]
        "wih_f": wih_f, "whh_f": whh_f, "b_f": b_f, "bhn_f": bhn_f,
        "wih_b": wih_b, "whh_b": whh_b, "b_b": b_b, "bhn_b": bhn_b,
        "w_fc": jnp.concatenate([params["w_fc"][0], params["w_fc"][1]], axis=0),    # [2H, D]
        "b_fc": params["b_fc"],                                                     # [1, D]
    }


# ----------------------------- Encoder forward (wrapper) -----------------------------
@jax.jit
def encoder_forward(src, pp):
    T, B = src.shape
    H = pp["whh_f"].shape[0]
    D = pp["w_fc"].shape[1]
    src_col = src.reshape(T * B, 1).astype(jnp.int32)   # lane-friendly index column

    outputs, hidden = pl.pallas_call(
        encoder_kernel,
        out_shape=(jax.ShapeDtypeStruct((T, B, 2 * H), jnp.float32),
                   jax.ShapeDtypeStruct((B, D), jnp.float32)),
    )(src_col, pp["embedding"],
      pp["wih_f"], pp["whh_f"], pp["b_f"], pp["bhn_f"],
      pp["wih_b"], pp["whh_b"], pp["b_b"], pp["bhn_b"],
      pp["w_fc"], pp["b_fc"])
    return outputs, hidden


# ----------------------------- Pure-JAX reference -----------------------------
def gru_ref(x, wih, whh, bih, bhh, reverse):
    T, B, E = x.shape
    H = whh.shape[1]
    xs = x[::-1] if reverse else x

    def step(h, xt):
        r = jax.nn.sigmoid(xt @ wih[0] + bih[0] + h @ whh[0] + bhh[0])
        z = jax.nn.sigmoid(xt @ wih[1] + bih[1] + h @ whh[1] + bhh[1])
        n = jnp.tanh(xt @ wih[2] + bih[2] + r * (h @ whh[2] + bhh[2]))
        hn = (1.0 - z) * n + z * h
        return hn, hn

    _, outs = jax.lax.scan(step, jnp.zeros((B, H), jnp.float32), xs)
    return outs[::-1] if reverse else outs


def encoder_ref(src, p):
    emb = p["embedding"][src].astype(jnp.float32)
    of = gru_ref(emb, p["wih_f"], p["whh_f"], p["bih_f"], p["bhh_f"], False)
    ob = gru_ref(emb, p["wih_b"], p["whh_b"], p["bih_b"], p["bhh_b"], True)
    outputs = jnp.concatenate([of, ob], axis=-1)
    hcat = jnp.concatenate([of[-1], ob[0]], axis=-1)
    w_full = jnp.concatenate([p["w_fc"][0], p["w_fc"][1]], axis=0)  # [2H, D]
    hidden = jnp.tanh(hcat @ w_full + p["b_fc"])
    return outputs, hidden


# ----------------------------- Main -----------------------------
if __name__ == "__main__":
    INPUT_DIM, EMB, ENC_H, DEC_H = 50, 32, 32, 32
    T, B = 8, 8

    key = jax.random.PRNGKey(0)
    ks = jax.random.split(key, 13)

    def u(k, shape, bound):
        return jax.random.uniform(k, shape, jnp.float32, -bound, bound)

    kg = 1.0 / math.sqrt(ENC_H)
    kf = 1.0 / math.sqrt(2 * ENC_H)

    params = {
        "embedding": jax.random.normal(ks[0], (INPUT_DIM, EMB), jnp.float32),
        # forward-direction GRU params (gate order r, z, n)
        "wih_f": u(ks[1], (3, EMB, ENC_H), kg),
        "whh_f": u(ks[2], (3, ENC_H, ENC_H), kg),
        "bih_f": u(ks[3], (3, 1, ENC_H), kg),
        "bhh_f": u(ks[4], (3, 1, ENC_H), kg),
        # backward-direction GRU params
        "wih_b": u(ks[5], (3, EMB, ENC_H), kg),
        "whh_b": u(ks[6], (3, ENC_H, ENC_H), kg),
        "bih_b": u(ks[7], (3, 1, ENC_H), kg),
        "bhh_b": u(ks[8], (3, 1, ENC_H), kg),
        # fc: Linear(2*ENC_H, DEC_H), stored as [2, ENC_H, DEC_H] (fwd half / bwd half)
        "w_fc": u(ks[9], (2, ENC_H, DEC_H), kf),
        "b_fc": u(ks[10], (1, DEC_H), kf),
    }

    src = jax.random.randint(ks[11], (T, B), 0, INPUT_DIM, dtype=jnp.int32)

    # One-time prepack (out of the per-call path).
    packed = prepack_encoder_params(params)
    jax.block_until_ready(packed)

    outputs, hidden = encoder_forward(src, packed)
    jax.block_until_ready((outputs, hidden))

    outputs_ref, hidden_ref = encoder_ref(src, params)
    assert outputs.shape == (T, B, 2 * ENC_H)
    assert hidden.shape == (B, DEC_H)
    assert jnp.allclose(outputs, outputs_ref, atol=1e-4, rtol=1e-4)
    assert jnp.allclose(hidden, hidden_ref, atol=1e-4, rtol=1e-4)

    print("KERNEL_OK")
</pallas_src>

<mosaic_0001>
module attributes {stable_mosaic.version = 11 : i64} {
  func.func @encoder_kernel(%arg0: memref<64x1xi32, #tpu.memory_space<vmem>>, %arg1: memref<50x32xf32, #tpu.memory_space<vmem>>, %arg2: memref<32x96xf32, #tpu.memory_space<vmem>>, %arg3: memref<32x96xf32, #tpu.memory_space<vmem>>, %arg4: memref<1x96xf32, #tpu.memory_space<vmem>>, %arg5: memref<1x32xf32, #tpu.memory_space<vmem>>, %arg6: memref<32x96xf32, #tpu.memory_space<vmem>>, %arg7: memref<32x96xf32, #tpu.memory_space<vmem>>, %arg8: memref<1x96xf32, #tpu.memory_space<vmem>>, %arg9: memref<1x32xf32, #tpu.memory_space<vmem>>, %arg10: memref<64x32xf32, #tpu.memory_space<vmem>>, %arg11: memref<1x32xf32, #tpu.memory_space<vmem>>, %arg12: memref<8x8x64xf32, #tpu.memory_space<vmem>>, %arg13: memref<8x32xf32, #tpu.memory_space<vmem>>) attributes {dimension_semantics = [], scalar_prefetch = 0 : i64, scratch_operands = 0 : i64, tpu.core_type = #tpu.core_type<tc>} {
    %c0 = arith.constant 0 : index
    %c0_0 = arith.constant 0 : index
    %0 = vector.load %arg0[%c0, %c0_0] : memref<64x1xi32, #tpu.memory_space<vmem>>, vector<64x1xi32>
    %1 = tpu.iota {dimensions = array<i32: 1>} : vector<64x50xi32>
    %2 = vector.broadcast %0 : vector<64x1xi32> to vector<64x50xi32>
    %3 = arith.cmpi eq, %2, %1 : vector<64x50xi32>
    %cst = arith.constant 1.000000e+00 : f32
    %cst_1 = arith.constant 0.000000e+00 : f32
    %4 = vector.broadcast %cst : f32 to vector<64x50xf32>
    %5 = vector.broadcast %cst_1 : f32 to vector<64x50xf32>
    %6 = arith.select %3, %4, %5 : vector<64x50xi1>, vector<64x50xf32>
    %c0_2 = arith.constant 0 : index
    %c0_3 = arith.constant 0 : index
    %7 = vector.load %arg1[%c0_2, %c0_3] : memref<50x32xf32, #tpu.memory_space<vmem>>, vector<50x32xf32>
    %cst_4 = arith.constant dense<0.000000e+00> : vector<64x32xf32>
    %8 = tpu.matmul %6, %7, %cst_4 {dimension_numbers = #tpu.dot_dimension_numbers<[1], [0], [0], [1], [0, 0, 1, 1], [], []>} : vector<64x50xf32>, vector<50x32xf32>, vector<64x32xf32> -> vector<64x32xf32>
    %c0_5 = arith.constant 0 : index
    %c0_6 = arith.constant 0 : index
    %9 = vector.load %arg2[%c0_5, %c0_6] : memref<32x96xf32, #tpu.memory_space<vmem>>, vector<32x96xf32>
    %cst_7 = arith.constant dense<0.000000e+00> : vector<64x96xf32>
    %10 = tpu.matmul %8, %9, %cst_7 {dimension_numbers = #tpu.dot_dimension_numbers<[1], [0], [0], [1], [0, 0, 1, 1], [], []>} : vector<64x32xf32>, vector<32x96xf32>, vector<64x96xf32> -> vector<64x96xf32>
    %c0_8 = arith.constant 0 : index
    %c0_9 = arith.constant 0 : index
    %11 = vector.load %arg4[%c0_8, %c0_9] : memref<1x96xf32, #tpu.memory_space<vmem>>, vector<1x96xf32>
    %12 = vector.broadcast %11 : vector<1x96xf32> to vector<64x96xf32>
    %13 = arith.addf %10, %12 : vector<64x96xf32>
    %c0_10 = arith.constant 0 : index
    %c0_11 = arith.constant 0 : index
    %14 = vector.load %arg6[%c0_10, %c0_11] : memref<32x96xf32, #tpu.memory_space<vmem>>, vector<32x96xf32>
    %cst_12 = arith.constant dense<0.000000e+00> : vector<64x96xf32>
    %15 = tpu.matmul %8, %14, %cst_12 {dimension_numbers = #tpu.dot_dimension_numbers<[1], [0], [0], [1], [0, 0, 1, 1], [], []>} : vector<64x32xf32>, vector<32x96xf32>, vector<64x96xf32> -> vector<64x96xf32>
    %c0_13 = arith.constant 0 : index
    %c0_14 = arith.constant 0 : index
    %16 = vector.load %arg8[%c0_13, %c0_14] : memref<1x96xf32, #tpu.memory_space<vmem>>, vector<1x96xf32>
    %17 = vector.broadcast %16 : vector<1x96xf32> to vector<64x96xf32>
    %18 = arith.addf %15, %17 : vector<64x96xf32>
    %c0_15 = arith.constant 0 : index
    %c0_16 = arith.constant 0 : index
    %19 = vector.load %arg3[%c0_15, %c0_16] : memref<32x96xf32, #tpu.memory_space<vmem>>, vector<32x96xf32>
    %c0_17 = arith.constant 0 : index
    %c0_18 = arith.constant 0 : index
    %20 = vector.load %arg5[%c0_17, %c0_18] : memref<1x32xf32, #tpu.memory_space<vmem>>, vector<1x32xf32>
    %c0_19 = arith.constant 0 : index
    %c0_20 = arith.constant 0 : index
    %21 = vector.load %arg7[%c0_19, %c0_20] : memref<32x96xf32, #tpu.memory_space<vmem>>, vector<32x96xf32>
    %c0_21 = arith.constant 0 : index
    %c0_22 = arith.constant 0 : index
    %22 = vector.load %arg9[%c0_21, %c0_22] : memref<1x32xf32, #tpu.memory_space<vmem>>, vector<1x32xf32>
    %cst_23 = arith.constant 0.000000e+00 : f32
    %23 = vector.broadcast %cst_23 : f32 to vector<8x32xf32>
    %cst_24 = arith.constant 0.000000e+00 : f32
    %24 = vector.broadcast %cst_24 : f32 to vector<8x32xf32>
    %25 = vector.extract_strided_slice %13 {offsets = [0, 0], sizes = [8, 96], strides = [1, 1]} : vector<64x96xf32> to vector<8x96xf32>
    %cst_25 = arith.constant dense<0.000000e+00> : vector<8x96xf32>
    %26 = tpu.matmul %23, %19, %cst_25 {dimension_numbers = #tpu.dot_dimension_numbers<[1], [0], [0], [1], [0, 0, 1, 1], [], []>} : vector<8x32xf32>, vector<32x96xf32>, vector<8x96xf32> -> vector<8x96xf32>
    %27 = vector.extract_strided_slice %25 {offsets = [0, 0], sizes = [8, 32], strides = [1, 1]} : vector<8x96xf32> to vector<8x32xf32>
    %28 = vector.extract_strided_slice %26 {offsets = [0, 0], sizes = [8, 32], strides = [1, 1]} : vector<8x96xf32> to vector<8x32xf32>
    %29 = arith.addf %27, %28 : vector<8x32xf32>
    %30 = arith.negf %29 : vector<8x32xf32>
    %31 = math.exp %30 : vector<8x32xf32>
    %cst_26 = arith.constant 1.000000e+00 : f32
    %32 = vector.broadcast %cst_26 : f32 to vector<8x32xf32>
    %33 = arith.addf %32, %31 : vector<8x32xf32>
    %34 = arith.divf %32, %33 : vector<8x32xf32>
    %35 = vector.extract_strided_slice %25 {offsets = [0, 32], sizes = [8, 32], strides = [1, 1]} : vector<8x96xf32> to vector<8x32xf32>
    %36 = vector.extract_strided_slice %26 {offsets = [0, 32], sizes = [8, 32], strides = [1, 1]} : vector<8x96xf32> to vector<8x32xf32>
    %37 = arith.addf %35, %36 : vector<8x32xf32>
    %38 = arith.negf %37 : vector<8x32xf32>
    %39 = math.exp %38 : vector<8x32xf32>
    %cst_27 = arith.constant 1.000000e+00 : f32
    %40 = vector.broadcast %cst_27 : f32 to vector<8x32xf32>
    %41 = arith.addf %40, %39 : vector<8x32xf32>
    %42 = arith.divf %40, %41 : vector<8x32xf32>
    %43 = vector.extract_strided_slice %25 {offsets = [0, 64], sizes = [8, 32], strides = [1, 1]} : vector<8x96xf32> to vector<8x32xf32>
    %44 = vector.extract_strided_slice %26 {offsets = [0, 64], sizes = [8, 32], strides = [1, 1]} : vector<8x96xf32> to vector<8x32xf32>
    %45 = vector.broadcast %20 : vector<1x32xf32> to vector<8x32xf32>
    %46 = arith.addf %44, %45 : vector<8x32xf32>
    %47 = arith.mulf %34, %46 : vector<8x32xf32>
    %48 = arith.addf %43, %47 : vector<8x32xf32>
    %49 = math.tanh %48 : vector<8x32xf32>
    %cst_28 = arith.constant 1.000000e+00 : f32
    %50 = vector.broadcast %cst_28 : f32 to vector<8x32xf32>
    %51 = arith.subf %50, %42 : vector<8x32xf32>
    %52 = arith.mulf %51, %49 : vector<8x32xf32>
    %53 = arith.mulf %42, %23 : vector<8x32xf32>
    %54 = arith.addf %52, %53 : vector<8x32xf32>
    %55 = vector.extract_strided_slice %18 {offsets = [56, 0], sizes = [8, 96], strides = [1, 1]} : vector<64x96xf32> to vector<8x96xf32>
    %cst_29 = arith.constant dense<0.000000e+00> : vector<8x96xf32>
    %56 = tpu.matmul %24, %21, %cst_29 {dimension_numbers = #tpu.dot_dimension_numbers<[1], [0], [0], [1], [0, 0, 1, 1], [], []>} : vector<8x32xf32>, vector<32x96xf32>, vector<8x96xf32> -> vector<8x96xf32>
    %57 = vector.extract_strided_slice %55 {offsets = [0, 0], sizes = [8, 32], strides = [1, 1]} : vector<8x96xf32> to vector<8x32xf32>
    %58 = vector.extract_strided_slice %56 {offsets = [0, 0], sizes = [8, 32], strides = [1, 1]} : vector<8x96xf32> to vector<8x32xf32>
    %59 = arith.addf %57, %58 : vector<8x32xf32>
    %60 = arith.negf %59 : vector<8x32xf32>
    %61 = math.exp %60 : vector<8x32xf32>
    %cst_30 = arith.constant 1.000000e+00 : f32
    %62 = vector.broadcast %cst_30 : f32 to vector<8x32xf32>
    %63 = arith.addf %62, %61 : vector<8x32xf32>
    %64 = arith.divf %62, %63 : vector<8x32xf32>
    %65 = vector.extract_strided_slice %55 {offsets = [0, 32], sizes = [8, 32], strides = [1, 1]} : vector<8x96xf32> to vector<8x32xf32>
    %66 = vector.extract_strided_slice %56 {offsets = [0, 32], sizes = [8, 32], strides = [1, 1]} : vector<8x96xf32> to vector<8x32xf32>
    %67 = arith.addf %65, %66 : vector<8x32xf32>
    %68 = arith.negf %67 : vector<8x32xf32>
    %69 = math.exp %68 : vector<8x32xf32>
    %cst_31 = arith.constant 1.000000e+00 : f32
    %70 = vector.broadcast %cst_31 : f32 to vector<8x32xf32>
    %71 = arith.addf %70, %69 : vector<8x32xf32>
    %72 = arith.divf %70, %71 : vector<8x32xf32>
    %73 = vector.extract_strided_slice %55 {offsets = [0, 64], sizes = [8, 32], strides = [1, 1]} : vector<8x96xf32> to vector<8x32xf32>
    %74 = vector.extract_strided_slice %56 {offsets = [0, 64], sizes = [8, 32], strides = [1, 1]} : vector<8x96xf32> to vector<8x32xf32>
    %75 = vector.broadcast %22 : vector<1x32xf32> to vector<8x32xf32>
    %76 = arith.addf %74, %75 : vector<8x32xf32>
    %77 = arith.mulf %64, %76 : vector<8x32xf32>
    %78 = arith.addf %73, %77 : vector<8x32xf32>
    %79 = math.tanh %78 : vector<8x32xf32>
    %cst_32 = arith.constant 1.000000e+00 : f32
    %80 = vector.broadcast %cst_32 : f32 to vector<8x32xf32>
    %81 = arith.subf %80, %72 : vector<8x32xf32>
    %82 = arith.mulf %81, %79 : vector<8x32xf32>
    %83 = arith.mulf %72, %24 : vector<8x32xf32>
    %84 = arith.addf %82, %83 : vector<8x32xf32>
    %c0_33 = arith.constant 0 : index
    %c0_34 = arith.constant 0 : index
    %c0_35 = arith.constant 0 : index
    %85 = vector.load %arg12[%c0_33, %c0_34, %c0_35] : memref<8x8x64xf32, #tpu.memory_space<vmem>>, vector<1x8x32xf32>
    %86 = vector.shape_cast %85 : vector<1x8x32xf32> to vector<8x32xf32>
    %87 = vector.shape_cast %54 : vector<8x32xf32> to vector<1x8x32xf32>
    tpu.vector_store %arg12[%c0_33, %c0_34, %c0_35], %87 {strides = array<i32>} : memref<8x8x64xf32, #tpu.memory_space<vmem>>, vector<1x8x32xf32>,
    %c7 = arith.constant 7 : index
    %c0_36 = arith.constant 0 : index
    %c32 = arith.constant 32 : index
    %88 = vector.load %arg12[%c7, %c0_36, %c32] : memref<8x8x64xf32, #tpu.memory_space<vmem>>, vector<1x8x32xf32>
    %89 = vector.shape_cast %88 : vector<1x8x32xf32> to vector<8x32xf32>
    %90 = vector.shape_cast %84 : vector<8x32xf32> to vector<1x8x32xf32>
    tpu.vector_store %arg12[%c7, %c0_36, %c32], %90 {strides = array<i32>} : memref<8x8x64xf32, #tpu.memory_space<vmem>>, vector<1x8x32xf32>,
    %91 = vector.extract_strided_slice %13 {offsets = [8, 0], sizes = [8, 96], strides = [1, 1]} : vector<64x96xf32> to vector<8x96xf32>
    %cst_37 = arith.constant dense<0.000000e+00> : vector<8x96xf32>
    %92 = tpu.matmul %54, %19, %cst_37 {dimension_numbers = #tpu.dot_dimension_numbers<[1], [0], [0], [1], [0, 0, 1, 1], [], []>} : vector<8x32xf32>, vector<32x96xf32>, vector<8x96xf32> -> vector<8x96xf32>
    %93 = vector.extract_strided_slice %91 {offsets = [0, 0], sizes = [8, 32], strides = [1, 1]} : vector<8x96xf32> to vector<8x32xf32>
    %94 = vector.extract_strided_slice %92 {offsets = [0, 0], sizes = [8, 32], strides = [1, 1]} : vector<8x96xf32> to vector<8x32xf32>
    %95 = arith.addf %93, %94 : vector<8x32xf32>
    %96 = arith.negf %95 : vector<8x32xf32>
    %97 = math.exp %96 : vector<8x32xf32>
    %cst_38 = arith.constant 1.000000e+00 : f32
    %98 = vector.broadcast %cst_38 : f32 to vector<8x32xf32>
    %99 = arith.addf %98, %97 : vector<8x32xf32>
    %100 = arith.divf %98, %99 : vector<8x32xf32>
    %101 = vector.extract_strided_slice %91 {offsets = [0, 32], sizes = [8, 32], strides = [1, 1]} : vector<8x96xf32> to vector<8x32xf32>
    %102 = vector.extract_strided_slice %92 {offsets = [0, 32], sizes = [8, 32], strides = [1, 1]} : vector<8x96xf32> to vector<8x32xf32>
    %103 = arith.addf %101, %102 : vector<8x32xf32>
    %104 = arith.negf %103 : vector<8x32xf32>
    %105 = math.exp %104 : vector<8x32xf32>
    %cst_39 = arith.constant 1.000000e+00 : f32
    %106 = vector.broadcast %cst_39 : f32 to vector<8x32xf32>
    %107 = arith.addf %106, %105 : vector<8x32xf32>
    %108 = arith.divf %106, %107 : vector<8x32xf32>
    %109 = vector.extract_strided_slice %91 {offsets = [0, 64], sizes = [8, 32], strides = [1, 1]} : vector<8x96xf32> to vector<8x32xf32>
    %110 = vector.extract_strided_slice %92 {offsets = [0, 64], sizes = [8, 32], strides = [1, 1]} : vector<8x96xf32> to vector<8x32xf32>
    %111 = vector.broadcast %20 : vector<1x32xf32> to vector<8x32xf32>
    %112 = arith.addf %110, %111 : vector<8x32xf32>
    %113 = arith.mulf %100, %112 : vector<8x32xf32>
    %114 = arith.addf %109, %113 : vector<8x32xf32>
    %115 = math.tanh %114 : vector<8x32xf32>
    %cst_40 = arith.constant 1.000000e+00 : f32
    %116 = vector.broadcast %cst_40 : f32 to vector<8x32xf32>
    %117 = arith.subf %116, %108 : vector<8x32xf32>
    %118 = arith.mulf %117, %115 : vector<8x32xf32>
    %119 = arith.mulf %108, %54 : vector<8x32xf32>
    %120 = arith.addf %118, %119 : vector<8x32xf32>
    %121 = vector.extract_strided_slice %18 {offsets = [48, 0], sizes = [8, 96], strides = [1, 1]} : vector<64x96xf32> to vector<8x96xf32>
    %cst_41 = arith.constant dense<0.000000e+00> : vector<8x96xf32>
    %122 = tpu.matmul %84, %21, %cst_41 {dimension_numbers = #tpu.dot_dimension_numbers<[1], [0], [0], [1], [0, 0, 1, 1], [], []>} : vector<8x32xf32>, vector<32x96xf32>, vector<8x96xf32> -> vector<8x96xf32>
    %123 = vector.extract_strided_slice %121 {offsets = [0, 0], sizes = [8, 32], strides = [1, 1]} : vector<8x96xf32> to vector<8x32xf32>
    %124 = vector.extract_strided_slice %122 {offsets = [0, 0], sizes = [8, 32], strides = [1, 1]} : vector<8x96xf32> to vector<8x32xf32>
    %125 = arith.addf %123, %124 : vector<8x32xf32>
    %126 = arith.negf %125 : vector<8x32xf32>
    %127 = math.exp %126 : vector<8x32xf32>
    %cst_42 = arith.constant 1.000000e+00 : f32
    %128 = vector.broadcast %cst_42 : f32 to vector<8x32xf32>
    %129 = arith.addf %128, %127 : vector<8x32xf32>
    %130 = arith.divf %128, %129 : vector<8x32xf32>
    %131 = vector.extract_strided_slice %121 {offsets = [0, 32], sizes = [8, 32], strides = [1, 1]} : vector<8x96xf32> to vector<8x32xf32>
    %132 = vector.extract_strided_slice %122 {offsets = [0, 32], sizes = [8, 32], strides = [1, 1]} : vector<8x96xf32> to vector<8x32xf32>
    %133 = arith.addf %131, %132 : vector<8x32xf32>
    %134 = arith.negf %133 : vector<8x32xf32>
    %135 = math.exp %134 : vector<8x32xf32>
    %cst_43 = arith.constant 1.000000e+00 : f32
    %136 = vector.broadcast %cst_43 : f32 to vector<8x32xf32>
    %137 = arith.addf %136, %135 : vector<8x32xf32>
    %138 = arith.divf %136, %137 : vector<8x32xf32>
    %139 = vector.extract_strided_slice %121 {offsets = [0, 64], sizes = [8, 32], strides = [1, 1]} : vector<8x96xf32> to vector<8x32xf32>
    %140 = vector.extract_strided_slice %122 {offsets = [0, 64], sizes = [8, 32], strides = [1, 1]} : vector<8x96xf32> to vector<8x32xf32>
    %141 = vector.broadcast %22 : vector<1x32xf32> to vector<8x32xf32>
    %142 = arith.addf %140, %141 : vector<8x32xf32>
    %143 = arith.mulf %130, %142 : vector<8x32xf32>
    %144 = arith.addf %139, %143 : vector<8x32xf32>
    %145 = math.tanh %144 : vector<8x32xf32>
    %cst_44 = arith.constant 1.000000e+00 : f32
    %146 = vector.broadcast %cst_44 : f32 to vector<8x32xf32>
    %147 = arith.subf %146, %138 : vector<8x32xf32>
    %148 = arith.mulf %147, %145 : vector<8x32xf32>
    %149 = arith.mulf %138, %84 : vector<8x32xf32>
    %150 = arith.addf %148, %149 : vector<8x32xf32>
    %c1 = arith.constant 1 : index
    %c0_45 = arith.constant 0 : index
    %c0_46 = arith.constant 0 : index
    %151 = vector.load %arg12[%c1, %c0_45, %c0_46] : memref<8x8x64xf32, #tpu.memory_space<vmem>>, vector<1x8x32xf32>
    %152 = vector.shape_cast %151 : vector<1x8x32xf32> to vector<8x32xf32>
    %153 = vector.shape_cast %120 : vector<8x32xf32> to vector<1x8x32xf32>
    tpu.vector_store %arg12[%c1, %c0_45, %c0_46], %153 {strides = array<i32>} : memref<8x8x64xf32, #tpu.memory_space<vmem>>, vector<1x8x32xf32>,
    %c6 = arith.constant 6 : index
    %c0_47 = arith.constant 0 : index
    %c32_48 = arith.constant 32 : index
    %154 = vector.load %arg12[%c6, %c0_47, %c32_48] : memref<8x8x64xf32, #tpu.memory_space<vmem>>, vector<1x8x32xf32>
    %155 = vector.shape_cast %154 : vector<1x8x32xf32> to vector<8x32xf32>
    %156 = vector.shape_cast %150 : vector<8x32xf32> to vector<1x8x32xf32>
    tpu.vector_store %arg12[%c6, %c0_47, %c32_48], %156 {strides = array<i32>} : memref<8x8x64xf32, #tpu.memory_space<vmem>>, vector<1x8x32xf32>,
    %157 = vector.extract_strided_slice %13 {offsets = [16, 0], sizes = [8, 96], strides = [1, 1]} : vector<64x96xf32> to vector<8x96xf32>
    %cst_49 = arith.constant dense<0.000000e+00> : vector<8x96xf32>
    %158 = tpu.matmul %120, %19, %cst_49 {dimension_numbers = #tpu.dot_dimension_numbers<[1], [0], [0], [1], [0, 0, 1, 1], [], []>} : vector<8x32xf32>, vector<32x96xf32>, vector<8x96xf32> -> vector<8x96xf32>
    %159 = vector.extract_strided_slice %157 {offsets = [0, 0], sizes = [8, 32], strides = [1, 1]} : vector<8x96xf32> to vector<8x32xf32>
    %160 = vector.extract_strided_slice %158 {offsets = [0, 0], sizes = [8, 32], strides = [1, 1]} : vector<8x96xf32> to vector<8x32xf32>
    %161 = arith.addf %159, %160 : vector<8x32xf32>
    %162 = arith.negf %161 : vector<8x32xf32>
    %163 = math.exp %162 : vector<8x32xf32>
    %cst_50 = arith.constant 1.000000e+00 : f32
    %164 = vector.broadcast %cst_50 : f32 to vector<8x32xf32>
    %165 = arith.addf %164, %163 : vector<8x32xf32>
    %166 = arith.divf %164, %165 : vector<8x32xf32>
    %167 = vector.extract_strided_slice %157 {offsets = [0, 32], sizes = [8, 32], strides = [1, 1]} : vector<8x96xf32> to vector<8x32xf32>
    %168 = vector.extract_strided_slice %158 {offsets = [0, 32], sizes = [8, 32], strides = [1, 1]} : vector<8x96xf32> to vector<8x32xf32>
    %169 = arith.addf %167, %168 : vector<8x32xf32>
    %170 = arith.negf %169 : vector<8x32xf32>
    %171 = math.exp %170 : vector<8x32xf32>
    %cst_51 = arith.constant 1.000000e+00 : f32
    %172 = vector.broadcast %cst_51 : f32 to vector<8x32xf32>
    %173 = arith.addf %172, %171 : vector<8x32xf32>
    %174 = arith.divf %172, %173 : vector<8x32xf32>
    %175 = vector.extract_strided_slice %157 {offsets = [0, 64], sizes = [8, 32], strides = [1, 1]} : vector<8x96xf32> to vector<8x32xf32>
    %176 = vector.extract_strided_slice %158 {offsets = [0, 64], sizes = [8, 32], strides = [1, 1]} : vector<8x96xf32> to vector<8x32xf32>
    %177 = vector.broadcast %20 : vector<1x32xf32> to vector<8x32xf32>
    %178 = arith.addf %176, %177 : vector<8x32xf32>
    %179 = arith.mulf %166, %178 : vector<8x32xf32>
    %180 = arith.addf %175, %179 : vector<8x32xf32>
    %181 = math.tanh %180 : vector<8x32xf32>
    %cst_52 = arith.constant 1.000000e+00 : f32
    %182 = vector.broadcast %cst_52 : f32 to vector<8x32xf32>
    %183 = arith.subf %182, %174 : vector<8x32xf32>
    %184 = arith.mulf %183, %181 : vector<8x32xf32>
    %185 = arith.mulf %174, %120 : vector<8x32xf32>
    %186 = arith.addf %184, %185 : vector<8x32xf32>
    %187 = vector.extract_strided_slice %18 {offsets = [40, 0], sizes = [8, 96], strides = [1, 1]} : vector<64x96xf32> to vector<8x96xf32>
    %cst_53 = arith.constant dense<0.000000e+00> : vector<8x96xf32>
    %188 = tpu.matmul %150, %21, %cst_53 {dimension_numbers = #tpu.dot_dimension_numbers<[1], [0], [0], [1], [0, 0, 1, 1], [], []>} : vector<8x32xf32>, vector<32x96xf32>, vector<8x96xf32> -> vector<8x96xf32>
    %189 = vector.extract_strided_slice %187 {offsets = [0, 0], sizes = [8, 32], strides = [1, 1]} : vector<8x96xf32> to vector<8x32xf32>
    %190 = vector.extract_strided_slice %188 {offsets = [0, 0], sizes = [8, 32], strides = [1, 1]} : vector<8x96xf32> to vector<8x32xf32>
    %191 = arith.addf %189, %190 : vector<8x32xf32>
    %192 = arith.negf %191 : vector<8x32xf32>
    %193 = math.exp %192 : vector<8x32xf32>
    %cst_54 = arith.constant 1.000000e+00 : f32
    %194 = vector.broadcast %cst_54 : f32 to vector<8x32xf32>
    %195 = arith.addf %194, %193 : vector<8x32xf32>
    %196 = arith.divf %194, %195 : vector<8x32xf32>
    %197 = vector.extract_strided_slice %187 {offsets = [0, 32], sizes = [8, 32], strides = [1, 1]} : vector<8x96xf32> to vector<8x32xf32>
    %198 = vector.extract_strided_slice %188 {offsets = [0, 32], sizes = [8, 32], strides = [1, 1]} : vector<8x96xf32> to vector<8x32xf32>
    %199 = arith.addf %197, %198 : vector<8x32xf32>
    %200 = arith.negf %199 : vector<8x32xf32>
    %201 = math.exp %200 : vector<8x32xf32>
    %cst_55 = arith.constant 1.000000e+00 : f32
    %202 = vector.broadcast %cst_55 : f32 to vector<8x32xf32>
    %203 = arith.addf %202, %201 : vector<8x32xf32>
    %204 = arith.divf %202, %203 : vector<8x32xf32>
    %205 = vector.extract_strided_slice %187 {offsets = [0, 64], sizes = [8, 32], strides = [1, 1]} : vector<8x96xf32> to vector<8x32xf32>
    %206 = vector.extract_strided_slice %188 {offsets = [0, 64], sizes = [8, 32], strides = [1, 1]} : vector<8x96xf32> to vector<8x32xf32>
    %207 = vector.broadcast %22 : vector<1x32xf32> to vector<8x32xf32>
    %208 = arith.addf %206, %207 : vector<8x32xf32>
    %209 = arith.mulf %196, %208 : vector<8x32xf32>
    %210 = arith.addf %205, %209 : vector<8x32xf32>
    %211 = math.tanh %210 : vector<8x32xf32>
    %cst_56 = arith.constant 1.000000e+00 : f32
    %212 = vector.broadcast %cst_56 : f32 to vector<8x32xf32>
    %213 = arith.subf %212, %204 : vector<8x32xf32>
    %214 = arith.mulf %213, %211 : vector<8x32xf32>
    %215 = arith.mulf %204, %150 : vector<8x32xf32>
    %216 = arith.addf %214, %215 : vector<8x32xf32>
    %c2 = arith.constant 2 : index
    %c0_57 = arith.constant 0 : index
    %c0_58 = arith.constant 0 : index
    %217 = vector.load %arg12[%c2, %c0_57, %c0_58] : memref<8x8x64xf32, #tpu.memory_space<vmem>>, vector<1x8x32xf32>
    %218 = vector.shape_cast %217 : vector<1x8x32xf32> to vector<8x32xf32>
    %219 = vector.shape_cast %186 : vector<8x32xf32> to vector<1x8x32xf32>
    tpu.vector_store %arg12[%c2, %c0_57, %c0_58], %219 {strides = array<i32>} : memref<8x8x64xf32, #tpu.memory_space<vmem>>, vector<1x8x32xf32>,
    %c5 = arith.constant 5 : index
    %c0_59 = arith.constant 0 : index
    %c32_60 = arith.constant 32 : index
    %220 = vector.load %arg12[%c5, %c0_59, %c32_60] : memref<8x8x64xf32, #tpu.memory_space<vmem>>, vector<1x8x32xf32>
    %221 = vector.shape_cast %220 : vector<1x8x32xf32> to vector<8x32xf32>
    %222 = vector.shape_cast %216 : vector<8x32xf32> to vector<1x8x32xf32>
    tpu.vector_store %arg12[%c5, %c0_59, %c32_60], %222 {strides = array<i32>} : memref<8x8x64xf32, #tpu.memory_space<vmem>>, vector<1x8x32xf32>,
    %223 = vector.extract_strided_slice %13 {offsets = [24, 0], sizes = [8, 96], strides = [1, 1]} : vector<64x96xf32> to vector<8x96xf32>
    %cst_61 = arith.constant dense<0.000000e+00> : vector<8x96xf32>
    %224 = tpu.matmul %186, %19, %cst_61 {dimension_numbers = #tpu.dot_dimension_numbers<[1], [0], [0], [1], [0, 0, 1, 1], [], []>} : vector<8x32xf32>, vector<32x96xf32>, vector<8x96xf32> -> vector<8x96xf32>
    %225 = vector.extract_strided_slice %223 {offsets = [0, 0], sizes = [8, 32], strides = [1, 1]} : vector<8x96xf32> to vector<8x32xf32>
    %226 = vector.extract_strided_slice %224 {offsets = [0, 0], sizes = [8, 32], strides = [1, 1]} : vector<8x96xf32> to vector<8x32xf32>
    %227 = arith.addf %225, %226 : vector<8x32xf32>
    %228 = arith.negf %227 : vector<8x32xf32>
    %229 = math.exp %228 : vector<8x32xf32>
    %cst_62 = arith.constant 1.000000e+00 : f32
    %230 = vector.broadcast %cst_62 : f32 to vector<8x32xf32>
    %231 = arith.addf %230, %229 : vector<8x32xf32>
    %232 = arith.divf %230, %231 : vector<8x32xf32>
    %233 = vector.extract_strided_slice %223 {offsets = [0, 32], sizes = [8, 32], strides = [1, 1]} : vector<8x96xf32> to vector<8x32xf32>
    %234 = vector.extract_strided_slice %224 {offsets = [0, 32], sizes = [8, 32], strides = [1, 1]} : vector<8x96xf32> to vector<8x32xf32>
    %235 = arith.addf %233, %234 : vector<8x32xf32>
    %236 = arith.negf %235 : vector<8x32xf32>
    %237 = math.exp %236 : vector<8x32xf32>
    %cst_63 = arith.constant 1.000000e+00 : f32
    %238 = vector.broadcast %cst_63 : f32 to vector<8x32xf32>
    %239 = arith.addf %238, %237 : vector<8x32xf32>
    %240 = arith.divf %238, %239 : vector<8x32xf32>
    %241 = vector.extract_strided_slice %223 {offsets = [0, 64], sizes = [8, 32], strides = [1, 1]} : vector<8x96xf32> to vector<8x32xf32>
    %242 = vector.extract_strided_slice %224 {offsets = [0, 64], sizes = [8, 32], strides = [1, 1]} : vector<8x96xf32> to vector<8x32xf32>
    %243 = vector.broadcast %20 : vector<1x32xf32> to vector<8x32xf32>
    %244 = arith.addf %242, %243 : vector<8x32xf32>
    %245 = arith.mulf %232, %244 : vector<8x32xf32>
    %246 = arith.addf %241, %245 : vector<8x32xf32>
    %247 = math.tanh %246 : vector<8x32xf32>
    %cst_64 = arith.constant 1.000000e+00 : f32
    %248 = vector.broadcast %cst_64 : f32 to vector<8x32xf32>
    %249 = arith.subf %248, %240 : vector<8x32xf32>
    %250 = arith.mulf %249, %247 : vector<8x32xf32>
    %251 = arith.mulf %240, %186 : vector<8x32xf32>
    %252 = arith.addf %250, %251 : vector<8x32xf32>
    %253 = vector.extract_strided_slice %18 {offsets = [32, 0], sizes = [8, 96], strides = [1, 1]} : vector<64x96xf32> to vector<8x96xf32>
    %cst_65 = arith.constant dense<0.000000e+00> : vector<8x96xf32>
    %254 = tpu.matmul %216, %21, %cst_65 {dimension_numbers = #tpu.dot_dimension_numbers<[1], [0], [0], [1], [0, 0, 1, 1], [], []>} : vector<8x32xf32>, vector<32x96xf32>, vector<8x96xf32> -> vector<8x96xf32>
    %255 = vector.extract_strided_slice %253 {offsets = [0, 0], sizes = [8, 32], strides = [1, 1]} : vector<8x96xf32> to vector<8x32xf32>
    %256 = vector.extract_strided_slice %254 {offsets = [0, 0], sizes = [8, 32], strides = [1, 1]} : vector<8x96xf32> to vector<8x32xf32>
    %257 = arith.addf %255, %256 : vector<8x32xf32>
    %258 = arith.negf %257 : vector<8x32xf32>
    %259 = math.exp %258 : vector<8x32xf32>
    %cst_66 = arith.constant 1.000000e+00 : f32
    %260 = vector.broadcast %cst_66 : f32 to vector<8x32xf32>
    %261 = arith.addf %260, %259 : vector<8x32xf32>
    %262 = arith.divf %260, %261 : vector<8x32xf32>
    %263 = vector.extract_strided_slice %253 {offsets = [0, 32], sizes = [8, 32], strides = [1, 1]} : vector<8x96xf32> to vector<8x32xf32>
    %264 = vector.extract_strided_slice %254 {offsets = [0, 32], sizes = [8, 32], strides = [1, 1]} : vector<8x96xf32> to vector<8x32xf32>
    %265 = arith.addf %263, %264 : vector<8x32xf32>
    %266 = arith.negf %265 : vector<8x32xf32>
    %267 = math.exp %266 : vector<8x32xf32>
    %cst_67 = arith.constant 1.000000e+00 : f32
    %268 = vector.broadcast %cst_67 : f32 to vector<8x32xf32>
    %269 = arith.addf %268, %267 : vector<8x32xf32>
    %270 = arith.divf %268, %269 : vector<8x32xf32>
    %271 = vector.extract_strided_slice %253 {offsets = [0, 64], sizes = [8, 32], strides = [1, 1]} : vector<8x96xf32> to vector<8x32xf32>
    %272 = vector.extract_strided_slice %254 {offsets = [0, 64], sizes = [8, 32], strides = [1, 1]} : vector<8x96xf32> to vector<8x32xf32>
    %273 = vector.broadcast %22 : vector<1x32xf32> to vector<8x32xf32>
    %274 = arith.addf %272, %273 : vector<8x32xf32>
    %275 = arith.mulf %262, %274 : vector<8x32xf32>
    %276 = arith.addf %271, %275 : vector<8x32xf32>
    %277 = math.tanh %276 : vector<8x32xf32>
    %cst_68 = arith.constant 1.000000e+00 : f32
    %278 = vector.broadcast %cst_68 : f32 to vector<8x32xf32>
    %279 = arith.subf %278, %270 : vector<8x32xf32>
    %280 = arith.mulf %279, %277 : vector<8x32xf32>
    %281 = arith.mulf %270, %216 : vector<8x32xf32>
    %282 = arith.addf %280, %281 : vector<8x32xf32>
    %c3 = arith.constant 3 : index
    %c0_69 = arith.constant 0 : index
    %c0_70 = arith.constant 0 : index
    %283 = vector.load %arg12[%c3, %c0_69, %c0_70] : memref<8x8x64xf32, #tpu.memory_space<vmem>>, vector<1x8x32xf32>
    %284 = vector.shape_cast %283 : vector<1x8x32xf32> to vector<8x32xf32>
    %285 = vector.shape_cast %252 : vector<8x32xf32> to vector<1x8x32xf32>
    tpu.vector_store %arg12[%c3, %c0_69, %c0_70], %285 {strides = array<i32>} : memref<8x8x64xf32, #tpu.memory_space<vmem>>, vector<1x8x32xf32>,
    %c4 = arith.constant 4 : index
    %c0_71 = arith.constant 0 : index
    %c32_72 = arith.constant 32 : index
    %286 = vector.load %arg12[%c4, %c0_71, %c32_72] : memref<8x8x64xf32, #tpu.memory_space<vmem>>, vector<1x8x32xf32>
    %287 = vector.shape_cast %286 : vector<1x8x32xf32> to vector<8x32xf32>
    %288 = vector.shape_cast %282 : vector<8x32xf32> to vector<1x8x32xf32>
    tpu.vector_store %arg12[%c4, %c0_71, %c32_72], %288 {strides = array<i32>} : memref<8x8x64xf32, #tpu.memory_space<vmem>>, vector<1x8x32xf32>,
    %289 = vector.extract_strided_slice %13 {offsets = [32, 0], sizes = [8, 96], strides = [1, 1]} : vector<64x96xf32> to vector<8x96xf32>
    %cst_73 = arith.constant dense<0.000000e+00> : vector<8x96xf32>
    %290 = tpu.matmul %252, %19, %cst_73 {dimension_numbers = #tpu.dot_dimension_numbers<[1], [0], [0], [1], [0, 0, 1, 1], [], []>} : vector<8x32xf32>, vector<32x96xf32>, vector<8x96xf32> -> vector<8x96xf32>
    %291 = vector.extract_strided_slice %289 {offsets = [0, 0], sizes = [8, 32], strides = [1, 1]} : vector<8x96xf32> to vector<8x32xf32>
    %292 = vector.extract_strided_slice %290 {offsets = [0, 0], sizes = [8, 32], strides = [1, 1]} : vector<8x96xf32> to vector<8x32xf32>
    %293 = arith.addf %291, %292 : vector<8x32xf32>
    %294 = arith.negf %293 : vector<8x32xf32>
    %295 = math.exp %294 : vector<8x32xf32>
    %cst_74 = arith.constant 1.000000e+00 : f32
    %296 = vector.broadcast %cst_74 : f32 to vector<8x32xf32>
    %297 = arith.addf %296, %295 : vector<8x32xf32>
    %298 = arith.divf %296, %297 : vector<8x32xf32>
    %299 = vector.extract_strided_slice %289 {offsets = [0, 32], sizes = [8, 32], strides = [1, 1]} : vector<8x96xf32> to vector<8x32xf32>
    %300 = vector.extract_strided_slice %290 {offsets = [0, 32], sizes = [8, 32], strides = [1, 1]} : vector<8x96xf32> to vector<8x32xf32>
    %301 = arith.addf %299, %300 : vector<8x32xf32>
    %302 = arith.negf %301 : vector<8x32xf32>
    %303 = math.exp %302 : vector<8x32xf32>
    %cst_75 = arith.constant 1.000000e+00 : f32
    %304 = vector.broadcast %cst_75 : f32 to vector<8x32xf32>
    %305 = arith.addf %304, %303 : vector<8x32xf32>
    %306 = arith.divf %304, %305 : vector<8x32xf32>
    %307 = vector.extract_strided_slice %289 {offsets = [0, 64], sizes = [8, 32], strides = [1, 1]} : vector<8x96xf32> to vector<8x32xf32>
    %308 = vector.extract_strided_slice %290 {offsets = [0, 64], sizes = [8, 32], strides = [1, 1]} : vector<8x96xf32> to vector<8x32xf32>
    %309 = vector.broadcast %20 : vector<1x32xf32> to vector<8x32xf32>
    %310 = arith.addf %308, %309 : vector<8x32xf32>
    %311 = arith.mulf %298, %310 : vector<8x32xf32>
    %312 = arith.addf %307, %311 : vector<8x32xf32>
    %313 = math.tanh %312 : vector<8x32xf32>
    %cst_76 = arith.constant 1.000000e+00 : f32
    %314 = vector.broadcast %cst_76 : f32 to vector<8x32xf32>
    %315 = arith.subf %314, %306 : vector<8x32xf32>
    %316 = arith.mulf %315, %313 : vector<8x32xf32>
    %317 = arith.mulf %306, %252 : vector<8x32xf32>
    %318 = arith.addf %316, %317 : vector<8x32xf32>
    %319 = vector.extract_strided_slice %18 {offsets = [24, 0], sizes = [8, 96], strides = [1, 1]} : vector<64x96xf32> to vector<8x96xf32>
    %cst_77 = arith.constant dense<0.000000e+00> : vector<8x96xf32>
    %320 = tpu.matmul %282, %21, %cst_77 {dimension_numbers = #tpu.dot_dimension_numbers<[1], [0], [0], [1], [0, 0, 1, 1], [], []>} : vector<8x32xf32>, vector<32x96xf32>, vector<8x96xf32> -> vector<8x96xf32>
    %321 = vector.extract_strided_slice %319 {offsets = [0, 0], sizes = [8, 32], strides = [1, 1]} : vector<8x96xf32> to vector<8x32xf32>
    %322 = vector.extract_strided_slice %320 {offsets = [0, 0], sizes = [8, 32], strides = [1, 1]} : vector<8x96xf32> to vector<8x32xf32>
    %323 = arith.addf %321, %322 : vector<8x32xf32>
    %324 = arith.negf %323 : vector<8x32xf32>
    %325 = math.exp %324 : vector<8x32xf32>
    %cst_78 = arith.constant 1.000000e+00 : f32
    %326 = vector.broadcast %cst_78 : f32 to vector<8x32xf32>
    %327 = arith.addf %326, %325 : vector<8x32xf32>
    %328 = arith.divf %326, %327 : vector<8x32xf32>
    %329 = vector.extract_strided_slice %319 {offsets = [0, 32], sizes = [8, 32], strides = [1, 1]} : vector<8x96xf32> to vector<8x32xf32>
    %330 = vector.extract_strided_slice %320 {offsets = [0, 32], sizes = [8, 32], strides = [1, 1]} : vector<8x96xf32> to vector<8x32xf32>
    %331 = arith.addf %329, %330 : vector<8x32xf32>
    %332 = arith.negf %331 : vector<8x32xf32>
    %333 = math.exp %332 : vector<8x32xf32>
    %cst_79 = arith.constant 1.000000e+00 : f32
    %334 = vector.broadcast %cst_79 : f32 to vector<8x32xf32>
    %335 = arith.addf %334, %333 : vector<8x32xf32>
    %336 = arith.divf %334, %335 : vector<8x32xf32>
    %337 = vector.extract_strided_slice %319 {offsets = [0, 64], sizes = [8, 32], strides = [1, 1]} : vector<8x96xf32> to vector<8x32xf32>
    %338 = vector.extract_strided_slice %320 {offsets = [0, 64], sizes = [8, 32], strides = [1, 1]} : vector<8x96xf32> to vector<8x32xf32>
    %339 = vector.broadcast %22 : vector<1x32xf32> to vector<8x32xf32>
    %340 = arith.addf %338, %339 : vector<8x32xf32>
    %341 = arith.mulf %328, %340 : vector<8x32xf32>
    %342 = arith.addf %337, %341 : vector<8x32xf32>
    %343 = math.tanh %342 : vector<8x32xf32>
    %cst_80 = arith.constant 1.000000e+00 : f32
    %344 = vector.broadcast %cst_80 : f32 to vector<8x32xf32>
    %345 = arith.subf %344, %336 : vector<8x32xf32>
    %346 = arith.mulf %345, %343 : vector<8x32xf32>
    %347 = arith.mulf %336, %282 : vector<8x32xf32>
    %348 = arith.addf %346, %347 : vector<8x32xf32>
    %c4_81 = arith.constant 4 : index
    %c0_82 = arith.constant 0 : index
    %c0_83 = arith.constant 0 : index
    %349 = vector.load %arg12[%c4_81, %c0_82, %c0_83] : memref<8x8x64xf32, #tpu.memory_space<vmem>>, vector<1x8x32xf32>
    %350 = vector.shape_cast %349 : vector<1x8x32xf32> to vector<8x32xf32>
    %351 = vector.shape_cast %318 : vector<8x32xf32> to vector<1x8x32xf32>
    tpu.vector_store %arg12[%c4_81, %c0_82, %c0_83], %351 {strides = array<i32>} : memref<8x8x64xf32, #tpu.memory_space<vmem>>, vector<1x8x32xf32>,
    %c3_84 = arith.constant 3 : index
    %c0_85 = arith.constant 0 : index
    %c32_86 = arith.constant 32 : index
    %352 = vector.load %arg12[%c3_84, %c0_85, %c32_86] : memref<8x8x64xf32, #tpu.memory_space<vmem>>, vector<1x8x32xf32>
    %353 = vector.shape_cast %352 : vector<1x8x32xf32> to vector<8x32xf32>
    %354 = vector.shape_cast %348 : vector<8x32xf32> to vector<1x8x32xf32>
    tpu.vector_store %arg12[%c3_84, %c0_85, %c32_86], %354 {strides = array<i32>} : memref<8x8x64xf32, #tpu.memory_space<vmem>>, vector<1x8x32xf32>,
    %355 = vector.extract_strided_slice %13 {offsets = [40, 0], sizes = [8, 96], strides = [1, 1]} : vector<64x96xf32> to vector<8x96xf32>
    %cst_87 = arith.constant dense<0.000000e+00> : vector<8x96xf32>
    %356 = tpu.matmul %318, %19, %cst_87 {dimension_numbers = #tpu.dot_dimension_numbers<[1], [0], [0], [1], [0, 0, 1, 1], [], []>} : vector<8x32xf32>, vector<32x96xf32>, vector<8x96xf32> -> vector<8x96xf32>
    %357 = vector.extract_strided_slice %355 {offsets = [0, 0], sizes = [8, 32], strides = [1, 1]} : vector<8x96xf32> to vector<8x32xf32>
    %358 = vector.extract_strided_slice %356 {offsets = [0, 0], sizes = [8, 32], strides = [1, 1]} : vector<8x96xf32> to vector<8x32xf32>
    %359 = arith.addf %357, %358 : vector<8x32xf32>
    %360 = arith.negf %359 : vector<8x32xf32>
    %361 = math.exp %360 : vector<8x32xf32>
    %cst_88 = arith.constant 1.000000e+00 : f32
    %362 = vector.broadcast %cst_88 : f32 to vector<8x32xf32>
    %363 = arith.addf %362, %361 : vector<8x32xf32>
    %364 = arith.divf %362, %363 : vector<8x32xf32>
    %365 = vector.extract_strided_slice %355 {offsets = [0, 32], sizes = [8, 32], strides = [1, 1]} : vector<8x96xf32> to vector<8x32xf32>
    %366 = vector.extract_strided_slice %356 {offsets = [0, 32], sizes = [8, 32], strides = [1, 1]} : vector<8x96xf32> to vector<8x32xf32>
    %367 = arith.addf %365, %366 : vector<8x32xf32>
    %368 = arith.negf %367 : vector<8x32xf32>
    %369 = math.exp %368 : vector<8x32xf32>
    %cst_89 = arith.constant 1.000000e+00 : f32
    %370 = vector.broadcast %cst_89 : f32 to vector<8x32xf32>
    %371 = arith.addf %370, %369 : vector<8x32xf32>
    %372 = arith.divf %370, %371 : vector<8x32xf32>
    %373 = vector.extract_strided_slice %355 {offsets = [0, 64], sizes = [8, 32], strides = [1, 1]} : vector<8x96xf32> to vector<8x32xf32>
    %374 = vector.extract_strided_slice %356 {offsets = [0, 64], sizes = [8, 32], strides = [1, 1]} : vector<8x96xf32> to vector<8x32xf32>
    %375 = vector.broadcast %20 : vector<1x32xf32> to vector<8x32xf32>
    %376 = arith.addf %374, %375 : vector<8x32xf32>
    %377 = arith.mulf %364, %376 : vector<8x32xf32>
    %378 = arith.addf %373, %377 : vector<8x32xf32>
    %379 = math.tanh %378 : vector<8x32xf32>
    %cst_90 = arith.constant 1.000000e+00 : f32
    %380 = vector.broadcast %cst_90 : f32 to vector<8x32xf32>
    %381 = arith.subf %380, %372 : vector<8x32xf32>
    %382 = arith.mulf %381, %379 : vector<8x32xf32>
    %383 = arith.mulf %372, %318 : vector<8x32xf32>
    %384 = arith.addf %382, %383 : vector<8x32xf32>
    %385 = vector.extract_strided_slice %18 {offsets = [16, 0], sizes = [8, 96], strides = [1, 1]} : vector<64x96xf32> to vector<8x96xf32>
    %cst_91 = arith.constant dense<0.000000e+00> : vector<8x96xf32>
    %386 = tpu.matmul %348, %21, %cst_91 {dimension_numbers = #tpu.dot_dimension_numbers<[1], [0], [0], [1], [0, 0, 1, 1], [], []>} : vector<8x32xf32>, vector<32x96xf32>, vector<8x96xf32> -> vector<8x96xf32>
    %387 = vector.extract_strided_slice %385 {offsets = [0, 0], sizes = [8, 32], strides = [1, 1]} : vector<8x96xf32> to vector<8x32xf32>
    %388 = vector.extract_strided_slice %386 {offsets = [0, 0], sizes = [8, 32], strides = [1, 1]} : vector<8x96xf32> to vector<8x32xf32>
    %389 = arith.addf %387, %388 : vector<8x32xf32>
    %390 = arith.negf %389 : vector<8x32xf32>
    %391 = math.exp %390 : vector<8x32xf32>
    %cst_92 = arith.constant 1.000000e+00 : f32
    %392 = vector.broadcast %cst_92 : f32 to vector<8x32xf32>
    %393 = arith.addf %392, %391 : vector<8x32xf32>
    %394 = arith.divf %392, %393 : vector<8x32xf32>
    %395 = vector.extract_strided_slice %385 {offsets = [0, 32], sizes = [8, 32], strides = [1, 1]} : vector<8x96xf32> to vector<8x32xf32>
    %396 = vector.extract_strided_slice %386 {offsets = [0, 32], sizes = [8, 32], strides = [1, 1]} : vector<8x96xf32> to vector<8x32xf32>
    %397 = arith.addf %395, %396 : vector<8x32xf32>
    %398 = arith.negf %397 : vector<8x32xf32>
    %399 = math.exp %398 : vector<8x32xf32>
    %cst_93 = arith.constant 1.000000e+00 : f32
    %400 = vector.broadcast %cst_93 : f32 to vector<8x32xf32>
    %401 = arith.addf %400, %399 : vector<8x32xf32>
    %402 = arith.divf %400, %401 : vector<8x32xf32>
    %403 = vector.extract_strided_slice %385 {offsets = [0, 64], sizes = [8, 32], strides = [1, 1]} : vector<8x96xf32> to vector<8x32xf32>
    %404 = vector.extract_strided_slice %386 {offsets = [0, 64], sizes = [8, 32], strides = [1, 1]} : vector<8x96xf32> to vector<8x32xf32>
    %405 = vector.broadcast %22 : vector<1x32xf32> to vector<8x32xf32>
    %406 = arith.addf %404, %405 : vector<8x32xf32>
    %407 = arith.mulf %394, %406 : vector<8x32xf32>
    %408 = arith.addf %403, %407 : vector<8x32xf32>
    %409 = math.tanh %408 : vector<8x32xf32>
    %cst_94 = arith.constant 1.000000e+00 : f32
    %410 = vector.broadcast %cst_94 : f32 to vector<8x32xf32>
    %411 = arith.subf %410, %402 : vector<8x32xf32>
    %412 = arith.mulf %411, %409 : vector<8x32xf32>
    %413 = arith.mulf %402, %348 : vector<8x32xf32>
    %414 = arith.addf %412, %413 : vector<8x32xf32>
    %c5_95 = arith.constant 5 : index
    %c0_96 = arith.constant 0 : index
    %c0_97 = arith.constant 0 : index
    %415 = vector.load %arg12[%c5_95, %c0_96, %c0_97] : memref<8x8x64xf32, #tpu.memory_space<vmem>>, vector<1x8x32xf32>
    %416 = vector.shape_cast %415 : vector<1x8x32xf32> to vector<8x32xf32>
    %417 = vector.shape_cast %384 : vector<8x32xf32> to vector<1x8x32xf32>
    tpu.vector_store %arg12[%c5_95, %c0_96, %c0_97], %417 {strides = array<i32>} : memref<8x8x64xf32, #tpu.memory_space<vmem>>, vector<1x8x32xf32>,
    %c2_98 = arith.constant 2 : index
    %c0_99 = arith.constant 0 : index
    %c32_100 = arith.constant 32 : index
    %418 = vector.load %arg12[%c2_98, %c0_99, %c32_100] : memref<8x8x64xf32, #tpu.memory_space<vmem>>, vector<1x8x32xf32>
    %419 = vector.shape_cast %418 : vector<1x8x32xf32> to vector<8x32xf32>
    %420 = vector.shape_cast %414 : vector<8x32xf32> to vector<1x8x32xf32>
    tpu.vector_store %arg12[%c2_98, %c0_99, %c32_100], %420 {strides = array<i32>} : memref<8x8x64xf32, #tpu.memory_space<vmem>>, vector<1x8x32xf32>,
    %421 = vector.extract_strided_slice %13 {offsets = [48, 0], sizes = [8, 96], strides = [1, 1]} : vector<64x96xf32> to vector<8x96xf32>
    %cst_101 = arith.constant dense<0.000000e+00> : vector<8x96xf32>
    %422 = tpu.matmul %384, %19, %cst_101 {dimension_numbers = #tpu.dot_dimension_numbers<[1], [0], [0], [1], [0, 0, 1, 1], [], []>} : vector<8x32xf32>, vector<32x96xf32>, vector<8x96xf32> -> vector<8x96xf32>
    %423 = vector.extract_strided_slice %421 {offsets = [0, 0], sizes = [8, 32], strides = [1, 1]} : vector<8x96xf32> to vector<8x32xf32>
    %424 = vector.extract_strided_slice %422 {offsets = [0, 0], sizes = [8, 32], strides = [1, 1]} : vector<8x96xf32> to vector<8x32xf32>
    %425 = arith.addf %423, %424 : vector<8x32xf32>
    %426 = arith.negf %425 : vector<8x32xf32>
    %427 = math.exp %426 : vector<8x32xf32>
    %cst_102 = arith.constant 1.000000e+00 : f32
    %428 = vector.broadcast %cst_102 : f32 to vector<8x32xf32>
    %429 = arith.addf %428, %427 : vector<8x32xf32>
    %430 = arith.divf %428, %429 : vector<8x32xf32>
    %431 = vector.extract_strided_slice %421 {offsets = [0, 32], sizes = [8, 32], strides = [1, 1]} : vector<8x96xf32> to vector<8x32xf32>
    %432 = vector.extract_strided_slice %422 {offsets = [0, 32], sizes = [8, 32], strides = [1, 1]} : vector<8x96xf32> to vector<8x32xf32>
    %433 = arith.addf %431, %432 : vector<8x32xf32>
    %434 = arith.negf %433 : vector<8x32xf32>
    %435 = math.exp %434 : vector<8x32xf32>
    %cst_103 = arith.constant 1.000000e+00 : f32
    %436 = vector.broadcast %cst_103 : f32 to vector<8x32xf32>
    %437 = arith.addf %436, %435 : vector<8x32xf32>
    %438 = arith.divf %436, %437 : vector<8x32xf32>
    %439 = vector.extract_strided_slice %421 {offsets = [0, 64], sizes = [8, 32], strides = [1, 1]} : vector<8x96xf32> to vector<8x32xf32>
    %440 = vector.extract_strided_slice %422 {offsets = [0, 64], sizes = [8, 32], strides = [1, 1]} : vector<8x96xf32> to vector<8x32xf32>
    %441 = vector.broadcast %20 : vector<1x32xf32> to vector<8x32xf32>
    %442 = arith.addf %440, %441 : vector<8x32xf32>
    %443 = arith.mulf %430, %442 : vector<8x32xf32>
    %444 = arith.addf %439, %443 : vector<8x32xf32>
    %445 = math.tanh %444 : vector<8x32xf32>
    %cst_104 = arith.constant 1.000000e+00 : f32
    %446 = vector.broadcast %cst_104 : f32 to vector<8x32xf32>
    %447 = arith.subf %446, %438 : vector<8x32xf32>
    %448 = arith.mulf %447, %445 : vector<8x32xf32>
    %449 = arith.mulf %438, %384 : vector<8x32xf32>
    %450 = arith.addf %448, %449 : vector<8x32xf32>
    %451 = vector.extract_strided_slice %18 {offsets = [8, 0], sizes = [8, 96], strides = [1, 1]} : vector<64x96xf32> to vector<8x96xf32>
    %cst_105 = arith.constant dense<0.000000e+00> : vector<8x96xf32>
    %452 = tpu.matmul %414, %21, %cst_105 {dimension_numbers = #tpu.dot_dimension_numbers<[1], [0], [0], [1], [0, 0, 1, 1], [], []>} : vector<8x32xf32>, vector<32x96xf32>, vector<8x96xf32> -> vector<8x96xf32>
    %453 = vector.extract_strided_slice %451 {offsets = [0, 0], sizes = [8, 32], strides = [1, 1]} : vector<8x96xf32> to vector<8x32xf32>
    %454 = vector.extract_strided_slice %452 {offsets = [0, 0], sizes = [8, 32], strides = [1, 1]} : vector<8x96xf32> to vector<8x32xf32>
    %455 = arith.addf %453, %454 : vector<8x32xf32>
    %456 = arith.negf %455 : vector<8x32xf32>
    %457 = math.exp %456 : vector<8x32xf32>
    %cst_106 = arith.constant 1.000000e+00 : f32
    %458 = vector.broadcast %cst_106 : f32 to vector<8x32xf32>
    %459 = arith.addf %458, %457 : vector<8x32xf32>
    %460 = arith.divf %458, %459 : vector<8x32xf32>
    %461 = vector.extract_strided_slice %451 {offsets = [0, 32], sizes = [8, 32], strides = [1, 1]} : vector<8x96xf32> to vector<8x32xf32>
    %462 = vector.extract_strided_slice %452 {offsets = [0, 32], sizes = [8, 32], strides = [1, 1]} : vector<8x96xf32> to vector<8x32xf32>
    %463 = arith.addf %461, %462 : vector<8x32xf32>
    %464 = arith.negf %463 : vector<8x32xf32>
    %465 = math.exp %464 : vector<8x32xf32>
    %cst_107 = arith.constant 1.000000e+00 : f32
    %466 = vector.broadcast %cst_107 : f32 to vector<8x32xf32>
    %467 = arith.addf %466, %465 : vector<8x32xf32>
    %468 = arith.divf %466, %467 : vector<8x32xf32>
    %469 = vector.extract_strided_slice %451 {offsets = [0, 64], sizes = [8, 32], strides = [1, 1]} : vector<8x96xf32> to vector<8x32xf32>
    %470 = vector.extract_strided_slice %452 {offsets = [0, 64], sizes = [8, 32], strides = [1, 1]} : vector<8x96xf32> to vector<8x32xf32>
    %471 = vector.broadcast %22 : vector<1x32xf32> to vector<8x32xf32>
    %472 = arith.addf %470, %471 : vector<8x32xf32>
    %473 = arith.mulf %460, %472 : vector<8x32xf32>
    %474 = arith.addf %469, %473 : vector<8x32xf32>
    %475 = math.tanh %474 : vector<8x32xf32>
    %cst_108 = arith.constant 1.000000e+00 : f32
    %476 = vector.broadcast %cst_108 : f32 to vector<8x32xf32>
    %477 = arith.subf %476, %468 : vector<8x32xf32>
    %478 = arith.mulf %477, %475 : vector<8x32xf32>
    %479 = arith.mulf %468, %414 : vector<8x32xf32>
    %480 = arith.addf %478, %479 : vector<8x32xf32>
    %c6_109 = arith.constant 6 : index
    %c0_110 = arith.constant 0 : index
    %c0_111 = arith.constant 0 : index
    %481 = vector.load %arg12[%c6_109, %c0_110, %c0_111] : memref<8x8x64xf32, #tpu.memory_space<vmem>>, vector<1x8x32xf32>
    %482 = vector.shape_cast %481 : vector<1x8x32xf32> to vector<8x32xf32>
    %483 = vector.shape_cast %450 : vector<8x32xf32> to vector<1x8x32xf32>
    tpu.vector_store %arg12[%c6_109, %c0_110, %c0_111], %483 {strides = array<i32>} : memref<8x8x64xf32, #tpu.memory_space<vmem>>, vector<1x8x32xf32>,
    %c1_112 = arith.constant 1 : index
    %c0_113 = arith.constant 0 : index
    %c32_114 = arith.constant 32 : index
    %484 = vector.load %arg12[%c1_112, %c0_113, %c32_114] : memref<8x8x64xf32, #tpu.memory_space<vmem>>, vector<1x8x32xf32>
    %485 = vector.shape_cast %484 : vector<1x8x32xf32> to vector<8x32xf32>
    %486 = vector.shape_cast %480 : vector<8x32xf32> to vector<1x8x32xf32>
    tpu.vector_store %arg12[%c1_112, %c0_113, %c32_114], %486 {strides = array<i32>} : memref<8x8x64xf32, #tpu.memory_space<vmem>>, vector<1x8x32xf32>,
    %487 = vector.extract_strided_slice %13 {offsets = [56, 0], sizes = [8, 96], strides = [1, 1]} : vector<64x96xf32> to vector<8x96xf32>
    %cst_115 = arith.constant dense<0.000000e+00> : vector<8x96xf32>
    %488 = tpu.matmul %450, %19, %cst_115 {dimension_numbers = #tpu.dot_dimension_numbers<[1], [0], [0], [1], [0, 0, 1, 1], [], []>} : vector<8x32xf32>, vector<32x96xf32>, vector<8x96xf32> -> vector<8x96xf32>
    %489 = vector.extract_strided_slice %487 {offsets = [0, 0], sizes = [8, 32], strides = [1, 1]} : vector<8x96xf32> to vector<8x32xf32>
    %490 = vector.extract_strided_slice %488 {offsets = [0, 0], sizes = [8, 32], strides = [1, 1]} : vector<8x96xf32> to vector<8x32xf32>
    %491 = arith.addf %489, %490 : vector<8x32xf32>
    %492 = arith.negf %491 : vector<8x32xf32>
    %493 = math.exp %492 : vector<8x32xf32>
    %cst_116 = arith.constant 1.000000e+00 : f32
    %494 = vector.broadcast %cst_116 : f32 to vector<8x32xf32>
    %495 = arith.addf %494, %493 : vector<8x32xf32>
    %496 = arith.divf %494, %495 : vector<8x32xf32>
    %497 = vector.extract_strided_slice %487 {offsets = [0, 32], sizes = [8, 32], strides = [1, 1]} : vector<8x96xf32> to vector<8x32xf32>
    %498 = vector.extract_strided_slice %488 {offsets = [0, 32], sizes = [8, 32], strides = [1, 1]} : vector<8x96xf32> to vector<8x32xf32>
    %499 = arith.addf %497, %498 : vector<8x32xf32>
    %500 = arith.negf %499 : vector<8x32xf32>
    %501 = math.exp %500 : vector<8x32xf32>
    %cst_117 = arith.constant 1.000000e+00 : f32
    %502 = vector.broadcast %cst_117 : f32 to vector<8x32xf32>
    %503 = arith.addf %502, %501 : vector<8x32xf32>
    %504 = arith.divf %502, %503 : vector<8x32xf32>
    %505 = vector.extract_strided_slice %487 {offsets = [0, 64], sizes = [8, 32], strides = [1, 1]} : vector<8x96xf32> to vector<8x32xf32>
    %506 = vector.extract_strided_slice %488 {offsets = [0, 64], sizes = [8, 32], strides = [1, 1]} : vector<8x96xf32> to vector<8x32xf32>
    %507 = vector.broadcast %20 : vector<1x32xf32> to vector<8x32xf32>
    %508 = arith.addf %506, %507 : vector<8x32xf32>
    %509 = arith.mulf %496, %508 : vector<8x32xf32>
    %510 = arith.addf %505, %509 : vector<8x32xf32>
    %511 = math.tanh %510 : vector<8x32xf32>
    %cst_118 = arith.constant 1.000000e+00 : f32
    %512 = vector.broadcast %cst_118 : f32 to vector<8x32xf32>
    %513 = arith.subf %512, %504 : vector<8x32xf32>
    %514 = arith.mulf %513, %511 : vector<8x32xf32>
    %515 = arith.mulf %504, %450 : vector<8x32xf32>
    %516 = arith.addf %514, %515 : vector<8x32xf32>
    %517 = vector.extract_strided_slice %18 {offsets = [0, 0], sizes = [8, 96], strides = [1, 1]} : vector<64x96xf32> to vector<8x96xf32>
    %cst_119 = arith.constant dense<0.000000e+00> : vector<8x96xf32>
    %518 = tpu.matmul %480, %21, %cst_119 {dimension_numbers = #tpu.dot_dimension_numbers<[1], [0], [0], [1], [0, 0, 1, 1], [], []>} : vector<8x32xf32>, vector<32x96xf32>, vector<8x96xf32> -> vector<8x96xf32>
    %519 = vector.extract_strided_slice %517 {offsets = [0, 0], sizes = [8, 32], strides = [1, 1]} : vector<8x96xf32> to vector<8x32xf32>
    %520 = vector.extract_strided_slice %518 {offsets = [0, 0], sizes = [8, 32], strides = [1, 1]} : vector<8x96xf32> to vector<8x32xf32>
    %521 = arith.addf %519, %520 : vector<8x32xf32>
    %522 = arith.negf %521 : vector<8x32xf32>
    %523 = math.exp %522 : vector<8x32xf32>
    %cst_120 = arith.constant 1.000000e+00 : f32
    %524 = vector.broadcast %cst_120 : f32 to vector<8x32xf32>
    %525 = arith.addf %524, %523 : vector<8x32xf32>
    %526 = arith.divf %524, %525 : vector<8x32xf32>
    %527 = vector.extract_strided_slice %517 {offsets = [0, 32], sizes = [8, 32], strides = [1, 1]} : vector<8x96xf32> to vector<8x32xf32>
    %528 = vector.extract_strided_slice %518 {offsets = [0, 32], sizes = [8, 32], strides = [1, 1]} : vector<8x96xf32> to vector<8x32xf32>
    %529 = arith.addf %527, %528 : vector<8x32xf32>
    %530 = arith.negf %529 : vector<8x32xf32>
    %531 = math.exp %530 : vector<8x32xf32>
    %cst_121 = arith.constant 1.000000e+00 : f32
    %532 = vector.broadcast %cst_121 : f32 to vector<8x32xf32>
    %533 = arith.addf %532, %531 : vector<8x32xf32>
    %534 = arith.divf %532, %533 : vector<8x32xf32>
    %535 = vector.extract_strided_slice %517 {offsets = [0, 64], sizes = [8, 32], strides = [1, 1]} : vector<8x96xf32> to vector<8x32xf32>
    %536 = vector.extract_strided_slice %518 {offsets = [0, 64], sizes = [8, 32], strides = [1, 1]} : vector<8x96xf32> to vector<8x32xf32>
    %537 = vector.broadcast %22 : vector<1x32xf32> to vector<8x32xf32>
    %538 = arith.addf %536, %537 : vector<8x32xf32>
    %539 = arith.mulf %526, %538 : vector<8x32xf32>
    %540 = arith.addf %535, %539 : vector<8x32xf32>
    %541 = math.tanh %540 : vector<8x32xf32>
    %cst_122 = arith.constant 1.000000e+00 : f32
    %542 = vector.broadcast %cst_122 : f32 to vector<8x32xf32>
    %543 = arith.subf %542, %534 : vector<8x32xf32>
    %544 = arith.mulf %543, %541 : vector<8x32xf32>
    %545 = arith.mulf %534, %480 : vector<8x32xf32>
    %546 = arith.addf %544, %545 : vector<8x32xf32>
    %c7_123 = arith.constant 7 : index
    %c0_124 = arith.constant 0 : index
    %c0_125 = arith.constant 0 : index
    %547 = vector.load %arg12[%c7_123, %c0_124, %c0_125] : memref<8x8x64xf32, #tpu.memory_space<vmem>>, vector<1x8x32xf32>
    %548 = vector.shape_cast %547 : vector<1x8x32xf32> to vector<8x32xf32>
    %549 = vector.shape_cast %516 : vector<8x32xf32> to vector<1x8x32xf32>
    tpu.vector_store %arg12[%c7_123, %c0_124, %c0_125], %549 {strides = array<i32>} : memref<8x8x64xf32, #tpu.memory_space<vmem>>, vector<1x8x32xf32>,
    %c0_126 = arith.constant 0 : index
    %c0_127 = arith.constant 0 : index
    %c32_128 = arith.constant 32 : index
    %550 = vector.load %arg12[%c0_126, %c0_127, %c32_128] : memref<8x8x64xf32, #tpu.memory_space<vmem>>, vector<1x8x32xf32>
    %551 = vector.shape_cast %550 : vector<1x8x32xf32> to vector<8x32xf32>
    %552 = vector.shape_cast %546 : vector<8x32xf32> to vector<1x8x32xf32>
    tpu.vector_store %arg12[%c0_126, %c0_127, %c32_128], %552 {strides = array<i32>} : memref<8x8x64xf32, #tpu.memory_space<vmem>>, vector<1x8x32xf32>,
    %553 = tpu.concatenate %516, %546 in 1 : vector<8x32xf32>, vector<8x32xf32> -> vector<8x64xf32>
    %c0_129 = arith.constant 0 : index
    %c0_130 = arith.constant 0 : index
    %554 = vector.load %arg10[%c0_129, %c0_130] : memref<64x32xf32, #tpu.memory_space<vmem>>, vector<64x32xf32>
    %cst_131 = arith.constant dense<0.000000e+00> : vector<8x32xf32>
    %555 = tpu.matmul %553, %554, %cst_131 {dimension_numbers = #tpu.dot_dimension_numbers<[1], [0], [0], [1], [0, 0, 1, 1], [], []>} : vector<8x64xf32>, vector<64x32xf32>, vector<8x32xf32> -> vector<8x32xf32>
    %c0_132 = arith.constant 0 : index
    %c0_133 = arith.constant 0 : index
    %556 = vector.load %arg11[%c0_132, %c0_133] : memref<1x32xf32, #tpu.memory_space<vmem>>, vector<1x32xf32>
    %557 = vector.broadcast %556 : vector<1x32xf32> to vector<8x32xf32>
    %558 = arith.addf %555, %557 : vector<8x32xf32>
    %559 = math.tanh %558 : vector<8x32xf32>
    %c0_134 = arith.constant 0 : index
    %c0_135 = arith.constant 0 : index
    %560 = vector.load %arg13[%c0_134, %c0_135] : memref<8x32xf32, #tpu.memory_space<vmem>>, vector<8x32xf32>
    tpu.vector_store %arg13[%c0_134, %c0_135], %559 {strides = array<i32>} : memref<8x32xf32, #tpu.memory_space<vmem>>, vector<8x32xf32>,
    return
  }
}

</mosaic_0001>

<bundles_post_ra>
// kernel: encoder_forward.1
= control target key start
LH: loop header
LB: loop body
LE: loop exit
PB: predicated region body
PF: predicated region fallthrough
CT: control target
= control target key end

     0   :  { %19 = vsyncpa [#allocation3], 0  ;;  %v3049_v2 = vmov 0   ;;  %s3665_s0 = inlined_call_operand.vmem [shape: s32[64,1], index: 0, kind: input, shape index: {}]   ;;  %s3666_s1 = inlined_call_operand.vmem [shape: f32[50,32], index: 1, kind: input, shape index: {}]   ;;  %s3667_s2 = inlined_call_operand.vmem [shape: f32[32,96], index: 2, kind: input, shape index: {}]   ;;  %s3668_s3 = inlined_call_operand.vmem [shape: f32[32,96], index: 3, kind: input, shape index: {}]   ;;  %s3669_s4 = inlined_call_operand.vmem [shape: f32[1,96], index: 4, kind: input, shape index: {}]   ;;  %s3670_s5 = inlined_call_operand.vmem [shape: f32[1,32], index: 5, kind: input, shape index: {}]   ;;  %s3671_s6 = inlined_call_operand.vmem [shape: f32[32,96], index: 6, kind: input, shape index: {}]   ;;  %s3672_s7 = inlined_call_operand.vmem [shape: f32[32,96], index: 7, kind: input, shape index: {}]   ;;  %s3673_s8 = inlined_call_operand.vmem [shape: f32[1,96], index: 8, kind: input, shape index: {}]   ;;  %s3674_s9 = inlined_call_operand.vmem [shape: f32[1,32], index: 9, kind: input, shape index: {}]   ;;  %s3675_s10 = inlined_call_operand.vmem [shape: f32[64,32], index: 10, kind: input, shape index: {}]   ;;  %s3676_s11 = inlined_call_operand.vmem [shape: f32[1,32], index: 11, kind: input, shape index: {}]   ;;  %s3677_s12 = inlined_call_operand.hbm [shape: f32[8,8,64], index: 12, kind: output, shape index: {0}]   ;;  %s3678_s13 = inlined_call_operand.hbm [shape: f32[8,32], index: 13, kind: output, shape index: {1}]  }
   0x1   :  { %v47_v0 = vld [vmem:[%s3665_s0 + $0x10] sm:$0xff]  ;;  %v45_v1 = vld [vmem:[%s3665_s0] sm:$0xff]  ;;  %2902 = vset.pattern.permute.xlu1 %v3049_v2  ;;  %2901 = vset.pattern.permute.xlu0 %v3049_v2  ;;  %v48_v3 = vld [vmem:[%s3665_s0 + $0x18] sm:$0xff] }
   0x2   :  { %62 = vperm.xlu1 %2902, %v47_v0   ;;  %56 = vperm.xlu0 %2901, %v45_v1   ;;  %v46_v4 = vld [vmem:[%s3665_s0 + $0x8] sm:$0xff]  ;;  %v95_v5 = vld [vmem:[%s3666_s1] sm:$0xff]  ;;  %v97_v7 = vld [vmem:[%s3666_s1 + $0x10] sm:$0xff] }
   0x3   :  { %v96_v6 = vld [vmem:[%s3666_s1 + $0x8] sm:$0xff]  ;;  %v98_v8 = vld [vmem:[%s3666_s1 + $0x18] sm:$0xff] }
   0x4   :  { %v2751_v9 = vpack.c.bf16 %v96_v6, %v95_v5 }
   0x5   :  { %20 = vsyncpa [#allocation5], 0  ;;  %v2755_v10 = vpack.c.bf16 %v98_v8, %v97_v7  ;;  %v99_v11 = vld [vmem:[%s3666_s1 + $0x20] sm:$0xff]  ;;  %v100_v12 = vld [vmem:[%s3666_s1 + $0x28] sm:$0xff]  ;;  %vm127_vm0 = vcmask 1041408   ;;  %v53_v25 = vlaneseq  ;;  %vm102_vm1 = vcmask 408576  }
   0x6   :  { %65 = vperm.xlu1 %2902, %v48_v3   ;;  %59 = vperm.xlu0 %2901, %v46_v4   ;;  %v50_v13 = vld [vmem:[%s3665_s0 + $0x28] sm:$0xff]  ;;  %v49_v14 = vld [vmem:[%s3665_s0 + $0x20] sm:$0xff]  ;;  %v2759_v15 = vpack.c.bf16 %v100_v12, %v99_v11  ;;  %v52_v16 = vld [vmem:[%s3665_s0 + $0x38] sm:$0xff]  ;;  %v3050_v29 = vmov 0.0   ;;  %v3051_v44 = vmov 0.0|0.0   ;;  %s3052_s17 = smov 64  }
   0x7   :  { %2752 = vmatprep.subr.bf16.mxu0 %v2751_v9  ;;  %v51_v17 = vld [vmem:[%s3665_s0 + $0x30] sm:$0xff]  ;;  %v236_v19 = vld [vmem:[%s3667_s2] sm:$0xff]  ;;  %v237_v20 = vld [vmem:[%s3667_s2 + $0x8] sm:$0xff]  ;;  %v54_v26 = vand.u32 127, %v53_v25  ;;  %vm247_vm10 = vcmask 261120   ;;  %vm3053_vm11 = vmmov 0  }
   0x8   :  { %2754 = vmatpush3.bf16.msra.mxu0 %v2751_v9  ;;  %v101_v18 = vld [vmem:[%s3666_s1 + $0x30] sm:$0x3]  ;;  %v2763_v22 = vpack.c.bf16 %v237_v20, %v236_v19  ;;  %v239_v23 = vld [vmem:[%s3667_s2 + $0x18] sm:$0xff]  ;;  %v377_v45 = vld [vmem:[%s3671_s6] sm:$0xff]  ;;  %vm722_vm12 = vcmask 523520   ;;  %vm2195_vm13 = vcmask 523264  }
   0x9   :  { %2756 = vmatprep.subr.bf16.mxu0 %v2755_v10  ;;  %v238_v21 = vld [vmem:[%s3667_s2 + $0x10] sm:$0xff]  ;;  %v378_v46 = vld [vmem:[%s3671_s6 + $0x8] sm:$0xff]  ;;  %v2329_v48 = vld [vmem:[%s3670_s5] ss:$0 sm:$0xff] }
   0xa   :  { %71 = vperm.xlu1 %2902, %v50_v13   ;;  %68 = vperm.xlu0 %2901, %v49_v14   ;;  %v2767_v24 = vpack.c.bf16 %v239_v23, %v238_v21  ;;  %v2771_v47 = vpack.c.bf16 %v378_v46, %v377_v45  ;;  %v2331_v49 = vld [vmem:[%s3674_s9] ss:$0 sm:$0xff]  ;;  %v494_v51 = vld [vmem:[%s3668_s3 + $0x8] sm:$0xff]  ;;  %v495_v55 = vld [vmem:[%s3668_s3 + $0x10] sm:$0xff] }
   0xb   :  { %2887 = vmatprep.subr.bf16.mxu1 %v2763_v22  ;;  %v493_v50 = vld [vmem:[%s3668_s3] sm:$0xff]  ;;  %v496_v56 = vld [vmem:[%s3668_s3 + $0x18] sm:$0xff]  ;;  %v499_v61 = vld [vmem:[%s3672_s7 + $0x8] sm:$0xff] }
   0xc   :  { %2758 = vmatpush3.bf16.msra.mxu0 %v2755_v10  ;;  %2889 = vmatpush3.bf16.msra.mxu1 %v2763_v22  ;;  %v3223_v53 = vpack.c.bf16 %v494_v51, %v493_v50  ;;  %v3234_v58 = vpack.c.bf16 %v496_v56, %v495_v55  ;;  %v498_v60 = vld [vmem:[%s3672_s7] sm:$0xff]  ;;  %v379_v62 = vld [vmem:[%s3671_s6 + $0x10] sm:$0xff]  ;;  %v380_v63 = vld [vmem:[%s3671_s6 + $0x18] sm:$0xff] }
   0xd   :  { %2760 = vmatprep.subr.bf16.mxu0 %v2759_v15  ;;  %2888 = vmatprep.subr.bf16.mxu1 %v2767_v24  ;;  %v3254_v1 = vpack.c.bf16 %v499_v61, %v498_v60  ;;  %v2775_v3 = vpack.c.bf16 %v380_v63, %v379_v62  ;;  %v500_v4 = vld [vmem:[%s3672_s7 + $0x10] sm:$0xff]  ;;  %v501_v5 = vld [vmem:[%s3672_s7 + $0x18] sm:$0xff]  ;;  %v2310_v9 = vld [vmem:[%s3669_s4] ss:$0 sm:$0xff] }
   0xe   :  { %77 = vperm.xlu1 %2902, %v52_v16   ;;  %74 = vperm.xlu0 %2901, %v51_v17   ;;  %v3267_v7 = vpack.c.bf16 %v501_v5, %v500_v4 }
  0x10   :  { %2762 = vmatpush3.bf16.msra.mxu0 %v2759_v15  ;;  %2890 = vmatpush3.bf16.msra.mxu1 %v2767_v24 }
  0x11   :  { %2502 = vmatprep.subr.msk.mxu0 %vm127_vm0, %v101_v18  ;;  %2772 = vmatprep.subr.bf16.mxu1 %v2771_v47 }
  0x12   :  { %588 = vrot.lane.b32.xlu0 %v2329_v48, %s3052_s17  ;;  %693 = vrot.lane.b32.xlu1 %v2331_v49, %s3052_s17 }
  0x14   :  { %2503 = vmatpush3.msk.msra.mxu0 %vm127_vm0, %v101_v18 }
  0x15   :  { %2764 = vmatprep.subr.bf16.mxu0 %v2763_v22 }
  0x81   :  { %v63_v27 = vpop.permute.xlu1 %62  ;;  %v57_v28 = vpop.permute.xlu0 %56 }
  0x82   :  { %vm79_vm2 = vcmp.eq.s32.totalorder %v57_v28, %v54_v26  ;;  %vm81_vm3 = vcmp.eq.s32.totalorder %v63_v27, %v54_v26 }
  0x83   :  { %v87_v30 = vsel %vm79_vm2, 1.0, %v3050_v29  ;;  %v89_v33 = vsel %vm81_vm3, 1.0, %v3050_v29 }
  0x84   :  { %2504 = vmatprep.mubr.msk.f32.mxu0 %vm102_vm1, %v87_v30 }
  0x85   :  { %v66_v31 = vpop.permute.xlu1 %65  ;;  %v60_v32 = vpop.permute.xlu0 %59 }
  0x86   :  { %vm80_vm4 = vcmp.eq.s32.totalorder %v60_v32, %v54_v26  ;;  %vm82_vm5 = vcmp.eq.s32.totalorder %v66_v31, %v54_v26  ;;  %v2319_v31 = vld [vmem:[%s3673_s8] ss:$0 sm:$0xff]  ;;  %s3054_s8 = smov 96  }
  0x87   :  { %v88_v34 = vsel %vm80_vm4, 1.0, %v3050_v29  ;;  %v90_v37 = vsel %vm82_vm5, 1.0, %v3050_v29 }
  0x88   :  { %2505 = vmatmul.mubr.msk.f32.vlgmr.msra.gmra.mrb[0].mxu0 %vm102_vm1, %v88_v34 }
  0x89   :  { %v72_v35 = vpop.permute.xlu1 %71  ;;  %2507 = vmatprep.mubr.msk.f32.mxu0 %vm102_vm1, %v89_v33  ;;  %v69_v36 = vpop.permute.xlu0 %68  ;;  %2766 = vmatpush3.bf16.msra.mxu0 %v2763_v22 }
  0x8a   :  { %vm83_vm6 = vcmp.eq.s32.totalorder %v69_v36, %v54_v26  ;;  %2768 = vmatprep.subr.bf16.mxu0 %v2767_v24  ;;  %vm84_vm7 = vcmp.eq.s32.totalorder %v72_v35, %v54_v26 }
  0x8b   :  { %v91_v38 = vsel %vm83_vm6, 1.0, %v3050_v29  ;;  %v92_v41 = vsel %vm84_vm7, 1.0, %v3050_v29 }
  0x8c   :  { %2508 = vmatmul.mubr.msk.f32.gmra.mrb[2].mxu0 %vm102_vm1, %v90_v37 }
  0x8d   :  { %v78_v39 = vpop.permute.xlu1 %77  ;;  %2510 = vmatprep.mubr.msk.f32.mxu0 %vm102_vm1, %v91_v38  ;;  %v75_v40 = vpop.permute.xlu0 %74  ;;  %2770 = vmatpush3.bf16.msra.mxu0 %v2767_v24 }
  0x8e   :  { %vm85_vm8 = vcmp.eq.s32.totalorder %v75_v40, %v54_v26  ;;  %vm86_vm9 = vcmp.eq.s32.totalorder %v78_v39, %v54_v26  ;;  %2779 = vmatprep.subr.bf16.mxu0 %v3051_v44 }
  0x8f   :  { %v93_v42 = vsel %vm85_vm8, 1.0, %v3050_v29  ;;  %v94_v43 = vsel %vm86_vm9, 1.0, %v3050_v29 }
  0x90   :  { %2511 = vmatmul.mubr.msk.f32.gmra.mrb[4].mxu0 %vm102_vm1, %v92_v41 }
  0x91   :  { %2513 = vmatprep.mubr.msk.f32.mxu0 %vm102_vm1, %v93_v42  ;;  %v3307_v17 = vpop.permute.xlu0 %588  ;;  %v3319_v30 = vpop.permute.xlu1 %693 }
  0x94   :  { %2514 = vmatmul.mubr.msk.f32.gmra.mrb[6].mxu0 %vm102_vm1, %v94_v43 }
 0x15b   :  { %v2506_v52 = vpop.f32.mrb[0].mxu0 }
 0x15c   :  { %v197_v54 = vpop.f32.mrb[1].mxu0 }
 0x15d   :  { %2524 = vmatprep.mubr.msk.f32.mxu0 %vm247_vm10, %v197_v54 }
 0x15e   :  { %2525 = vmatmul.mubr.msk.f32.vlgmr.msra.gmra.mrb[8].mxu0 %vm247_vm10, %v2506_v52 }
 0x15f   :  { %2781 = vmatpush3.bf16.msra.mxu0 %v3223_v53  ;;  %v2509_v57 = vpop.f32.mrb[2].mxu0 }
 0x160   :  { %v207_v59 = vpop.f32.mrb[3].mxu0  ;;  %2782 = vmatprep.subr.bf16.mxu0 %v3051_v44 }
 0x161   :  { %2527 = vmatprep.mubr.msk.f32.mxu0 %vm247_vm10, %v207_v59 }
 0x162   :  { %2528 = vmatmul.mubr.msk.f32.gmra.mrb[10].mxu0 %vm247_vm10, %v2509_v57 }
 0x163   :  { %2784 = vmatpush3.bf16.msra.mxu0 %v3234_v58  ;;  %v2512_v0 = vpop.f32.mrb[4].mxu0  ;;  %2564 = vmatprep.mubr.msk.f32.mxu0 %vm3053_vm11, %v3050_v29 }
 0x164   :  { %v217_v2 = vpop.f32.mrb[5].mxu0  ;;  %2785 = vmatprep.subr.bf16.mxu0 %v3051_v44 }
 0x165   :  { %2530 = vmatprep.mubr.msk.f32.mxu1 %vm247_vm10, %v217_v2 }
 0x166   :  { %2531 = vmatmul.mubr.msk.f32.vlgmr.msra.gmra.mrb[0].mxu1 %vm247_vm10, %v2512_v0  ;;  %2565 = vmatmul.mubr.f32.vlgmr.msra.gmra.mrb[12].mxu0 %v3050_v29 }
 0x167   :  { %2787 = vmatpush3.bf16.msra.mxu0 %v3254_v1  ;;  %v2515_v6 = vpop.f32.mrb[6].mxu0  ;;  %2774 = vmatpush3.bf16.msra.mxu1 %v2771_v47 }
 0x168   :  { %v227_v8 = vpop.f32.mrb[7].mxu0  ;;  %2788 = vmatprep.subr.bf16.mxu0 %v3051_v44  ;;  %2776 = vmatprep.subr.bf16.mxu1 %v2775_v3 }
 0x169   :  { %2533 = vmatprep.mubr.msk.f32.mxu1 %vm247_vm10, %v227_v8  ;;  %2575 = vmatprep.mubr.msk.f32.mxu0 %vm3053_vm11, %v3050_v29 }
 0x16a   :  { %2534 = vmatmul.mubr.msk.f32.gmra.mrb[2].mxu1 %vm247_vm10, %v2515_v6 }
 0x16b   :  { %2790 = vmatpush3.bf16.msra.mxu0 %v3267_v7  ;;  %2778 = vmatpush3.bf16.msra.mxu1 %v2775_v3 }
 0x16c   :  { %2544 = vmatprep.mubr.msk.f32.mxu1 %vm247_vm10, %v197_v54  ;;  %2791 = vmatprep.subr.bf16.mxu1 %v3051_v44 }
 0x16d   :  { %2797 = vmatprep.subr.bf16.mxu0 %v3051_v44 }
 0x16e   :  { %2576 = vmatmul.mubr.f32.vlgmr.msra.gmra.mrb[14].mxu0 %v3050_v29  ;;  %2545 = vmatmul.mubr.msk.f32.vlgmr.msra.gmra.mrb[4].mxu1 %vm247_vm10, %v2506_v52 }
 0x16f   :  { %2547 = vmatprep.mubr.msk.f32.mxu1 %vm247_vm10, %v207_v59  ;;  %2793 = vmatpush3.bf16.msra.mxu1 %v3223_v53 }
 0x170   :  { %2794 = vmatprep.subr.bf16.mxu1 %v3051_v44  ;;  %2799 = vmatpush3.bf16.msra.mxu0 %v3254_v1 }
 0x171   :  { %2800 = vmatprep.subr.bf16.mxu0 %v3051_v44  ;;  %2597 = vmatprep.mubr.msk.f32.mxu0 %vm3053_vm11, %v3050_v29 }
 0x172   :  { %2548 = vmatmul.mubr.msk.f32.gmra.mrb[6].mxu1 %vm247_vm10, %v2509_v57 }
 0x173   :  { %2550 = vmatprep.mubr.msk.f32.mxu1 %vm247_vm10, %v217_v2  ;;  %2796 = vmatpush3.bf16.msra.mxu1 %v3234_v58 }
 0x174   :  { %2802 = vmatpush3.bf16.msra.mxu0 %v3267_v7  ;;  %2803 = vmatprep.subr.bf16.mxu1 %v3051_v44 }
 0x175   :  { %2809 = vmatprep.subr.bf16.mxu0 %v3051_v44 }
 0x176   :  { %2551 = vmatmul.mubr.msk.f32.gmra.mrb[8].mxu1 %vm247_vm10, %v2512_v0 }
 0x177   :  { %2553 = vmatprep.mubr.msk.f32.mxu1 %vm247_vm10, %v227_v8 }
 0x17a   :  { %2554 = vmatmul.mubr.msk.f32.gmra.mrb[10].mxu1 %vm247_vm10, %v2515_v6 }
 0x17b   :  { %2586 = vmatprep.mubr.msk.f32.mxu1 %vm3053_vm11, %v3050_v29 }
 0x231   :  { %v2526_v10 = vpop.f32.mrb[8].mxu0 }
 0x232   :  { %v3301_v11 = vadd.f32 %v2526_v10, %v2310_v9  ;;  %v338_v12 = vpop.f32.mrb[9].mxu0 }
 0x233   :  { %v339_v51 = vadd.f32 %v2310_v9, %v338_v12 }
 0x235   :  { %v2529_v13 = vpop.f32.mrb[10].mxu0 }
 0x236   :  { %v3303_v14 = vadd.f32 %v2529_v13, %v2310_v9  ;;  %v348_v15 = vpop.f32.mrb[11].mxu0 }
 0x237   :  { %v3305_v16 = vadd.f32 %v2310_v9, %v348_v15 }
 0x239   :  { %v2532_v18 = vpop.f32.mrb[0].mxu1  ;;  %v572_v19 = vpop.f32.mrb[12].mxu0 }
 0x23a   :  { %v3309_v20 = vadd.f32 %v2532_v18, %v2310_v9  ;;  %v358_v21 = vpop.f32.mrb[1].mxu1  ;;  %v2566_v22 = vpop.f32.mrb[13].mxu0  ;;  %v591_v23 = vadd.f32 %v3307_v17, %v572_v19  ;;  %v576_v52 = vadd.f32 %v572_v19, %v339_v51 }
 0x23b   :  { %v3312_v24 = vadd.f32 %v2310_v9, %v358_v21 }
 0x23c   :  { %593 = vrot.lane.b32.xlu0 %v591_v23, %s3052_s17  ;;  %v2328_v54 = vmul.f32 -1.442695, %v576_v52 }
 0x23d   :  { %v2535_v25 = vpop.f32.mrb[2].mxu1 }
 0x23e   :  { %v3315_v26 = vadd.f32 %v2535_v25, %v2310_v9  ;;  %v368_v27 = vpop.f32.mrb[3].mxu1  ;;  %2903 = vpow2.f32 %v2328_v54 }
 0x23f   :  { %v3317_v28 = vadd.f32 %v2310_v9, %v368_v27 }
 0x241   :  { %v677_v32 = vpop.f32.mrb[14].mxu0  ;;  %v2546_v33 = vpop.f32.mrb[4].mxu1 }
 0x242   :  { %v696_v34 = vadd.f32 %v3319_v30, %v677_v32  ;;  %v3325_v35 = vadd.f32 %v2546_v33, %v2319_v31  ;;  %v454_v36 = vpop.f32.mrb[5].mxu1  ;;  %v2577_v37 = vpop.f32.mrb[15].mxu0 }
 0x243   :  { %v3327_v38 = vadd.f32 %v2319_v31, %v454_v36 }
 0x244   :  { %698 = vrot.lane.b32.xlu1 %v696_v34, %s3052_s17 }
 0x245   :  { %v2549_v39 = vpop.f32.mrb[6].mxu1 }
 0x246   :  { %v3330_v40 = vadd.f32 %v2549_v39, %v2319_v31  ;;  %v464_v41 = vpop.f32.mrb[7].mxu1 }
 0x247   :  { %v3332_v42 = vadd.f32 %v2319_v31, %v464_v41 }
 0x248   :  { %v2904_v59 = vpop.eup %2903 }
 0x249   :  { %v2552_v43 = vpop.f32.mrb[8].mxu1  ;;  %v580_v60 = vadd.f32 1.0, %v2904_v59 }
 0x24a   :  { %v3334_v45 = vadd.f32 %v2552_v43, %v2319_v31  ;;  %v474_v46 = vpop.f32.mrb[9].mxu1 }
 0x24b   :  { %v3336_v47 = vadd.f32 %v2319_v31, %v474_v46 }
 0x24d   :  { %v2555_v48 = vpop.f32.mrb[10].mxu1 }
 0x24e   :  { %v484_v49 = vpop.f32.mrb[11].mxu1  ;;  %v490_v55 = vadd.f32 %v2555_v48, %v2319_v31 }
 0x24f   :  { %v3338_v50 = vadd.f32 %v2319_v31, %v484_v49 }
 0x250   :  { %v681_v56 = vadd.f32 %v677_v32, %v490_v55 }
 0x252   :  { %v2330_v57 = vmul.f32 -1.442695, %v681_v56 }
 0x254   :  { %2905 = vpow2.f32 %v2330_v57 }
 0x255   :  { %2907 = vrcp.f32 %v580_v60 }
 0x25e   :  { %v2906_v61 = vpop.eup %2905 }
 0x25f   :  { %v685_v62 = vadd.f32 1.0, %v2906_v61  ;;  %v2908_v63 = vpop.eup %2907 }
 0x260   :  { %v603_v15 = vsub.f32 1.0, %v2908_v63  ;;  %v609_v19 = vmul.f32 0.0, %v2908_v63 }
 0x261   :  { %2909 = vrcp.f32 %v685_v62 }
 0x26b   :  { %v2910_v3 = vpop.eup %2909 }
 0x26c   :  { %v708_v23 = vsub.f32 1.0, %v2910_v3  ;;  %v714_v27 = vmul.f32 0.0, %v2910_v3 }
 0x2ae   :  { %v594_v0 = vpop.permute.xlu0 %593 }
 0x2af   :  { %v596_v2 = vmul.f32 %v2908_v63, %v594_v0 }
 0x2b1   :  { %598 = vrot.lane.b32.xlu0 %v596_v2, %s3052_s17 }
 0x2b6   :  { %v699_v4 = vpop.permute.xlu1 %698 }
 0x2b7   :  { %v701_v5 = vmul.f32 %v2910_v3, %v699_v4 }
 0x2b9   :  { %703 = vrot.lane.b32.xlu1 %v701_v5, %s3052_s17 }
 0x323   :  { %v599_v6 = vpop.permute.xlu0 %598 }
 0x324   :  { %v601_v8 = vadd.f32 %v599_v6, %v339_v51 }
 0x326   :  { %2911 = vtanh.f32 %v601_v8 }
 0x32b   :  { %v704_v9 = vpop.permute.xlu1 %703 }
 0x32c   :  { %v706_v10 = vadd.f32 %v704_v9, %v490_v55 }
 0x32e   :  { %2913 = vtanh.f32 %v706_v10 }
 0x330   :  { %v2912_v12 = vpop.eup %2911 }
 0x331   :  { %605 = vrot.lane.b32.xlu0 %v2912_v12, %s3054_s8 }
 0x338   :  { %v2914_v13 = vpop.eup %2913 }
 0x339   :  { %710 = vrot.lane.b32.xlu1 %v2914_v13, %s3054_s8 }
 0x3a3   :  { %v606_v18 = vpop.permute.xlu0 %605 }
 0x3a4   :  { %v608_v21 = vmul.f32 %v606_v18, %v603_v15 }
 0x3a6   :  { %v3344_v22 = vadd.f32 %v609_v19, %v608_v21 }
 0x3a8   :  { %717 = vrot.lane.b32.xlu0 %v3344_v22, %s3054_s8 }
 0x3ab   :  { %v711_v25 = vpop.permute.xlu1 %710 }
 0x3ac   :  { %v713_v31 = vmul.f32 %v711_v25, %v708_v23 }
 0x3ae   :  { %v3348_v32 = vadd.f32 %v714_v27, %v713_v31 }
 0x3b0   :  { %824 = vrot.lane.b32.xlu1 %v3348_v32, %s3054_s8  ;;  %723 = vst.msk [vmem:[#allocation2 + $0x38] sm:$0xff] %vm722_vm12, %v3348_v32 }
 0x41a   :  { %v718_v33 = vpop.permute.xlu0 %717 }
 0x41b   :  { %720 = vst.msk [vmem:[#allocation2] sm:$0xff] %vm247_vm10, %v718_v33  ;;  %2587 = vmatmul.mubr.msk.f32.vlgmr.msra.gmra.mrb[12].mxu1 %vm247_vm10, %v718_v33 }
 0x41c   :  { %2805 = vmatpush3.bf16.msra.mxu1 %v3223_v53  ;;  %2608 = vmatprep.mubr.msk.f32.mxu1 %vm3053_vm11, %v3050_v29 }
 0x41d   :  { %2806 = vmatprep.subr.bf16.mxu1 %v3051_v44 }
 0x420   :  { %2808 = vmatpush3.bf16.msra.mxu1 %v3234_v58 }
 0x421   :  { %2815 = vmatprep.subr.bf16.mxu1 %v3051_v44 }
 0x422   :  { %v825_v34 = vpop.permute.xlu1 %824 }
 0x423   :  { %2598 = vmatmul.mubr.msk.f32.vlgmr.msra.gmra.mrb[16].mxu0 %vm247_vm10, %v825_v34 }
 0x424   :  { %2811 = vmatpush3.bf16.msra.mxu0 %v3254_v1  ;;  %2619 = vmatprep.mubr.msk.f32.mxu0 %vm3053_vm11, %v3050_v29 }
 0x425   :  { %2812 = vmatprep.subr.bf16.mxu0 %v3051_v44 }
 0x428   :  { %2814 = vmatpush3.bf16.msra.mxu0 %v3267_v7 }
 0x429   :  { %2821 = vmatprep.subr.bf16.mxu0 %v3051_v44 }
 0x4ee   :  { %v792_v36 = vpop.f32.mrb[12].mxu1 }
 0x4ef   :  { %v803_v37 = vadd.f32 %v792_v36, %v3307_v17  ;;  %v2588_v39 = vpop.f32.mrb[13].mxu1  ;;  %v796_v48 = vadd.f32 %v792_v36, %v3301_v11 }
 0x4f1   :  { %805 = vrot.lane.b32.xlu0 %v803_v37, %s3052_s17  ;;  %v2333_v49 = vmul.f32 -1.442695, %v796_v48 }
 0x4f3   :  { %2915 = vpow2.f32 %v2333_v49 }
 0x4f6   :  { %v894_v41 = vpop.f32.mrb[16].mxu0 }
 0x4f7   :  { %v905_v43 = vadd.f32 %v894_v41, %v3319_v30  ;;  %v2599_v46 = vpop.f32.mrb[17].mxu0  ;;  %v898_v51 = vadd.f32 %v894_v41, %v3338_v50 }
 0x4f9   :  { %907 = vrot.lane.b32.xlu1 %v905_v43, %s3052_s17  ;;  %v2335_v52 = vmul.f32 -1.442695, %v898_v51 }
 0x4fb   :  { %2917 = vpow2.f32 %v2335_v52 }
 0x4fd   :  { %v2916_v54 = vpop.eup %2915 }
 0x4fe   :  { %v800_v55 = vadd.f32 1.0, %v2916_v54 }
 0x500   :  { %2919 = vrcp.f32 %v800_v55 }
 0x505   :  { %v2918_v56 = vpop.eup %2917 }
 0x506   :  { %v902_v57 = vadd.f32 1.0, %v2918_v56 }
 0x508   :  { %2921 = vrcp.f32 %v902_v57 }
 0x50a   :  { %v2920_v59 = vpop.eup %2919 }
 0x50b   :  { %v815_v9 = vsub.f32 1.0, %v2920_v59  ;;  %v821_v12 = vmul.f32 %v2920_v59, %v3344_v22 }
 0x512   :  { %v2922_v62 = vpop.eup %2921 }
 0x563   :  { %v806_v60 = vpop.permute.xlu0 %805 }
 0x564   :  { %v808_v61 = vmul.f32 %v2920_v59, %v806_v60 }
 0x566   :  { %810 = vrot.lane.b32.xlu0 %v808_v61, %s3052_s17 }
 0x56b   :  { %v908_v63 = vpop.permute.xlu1 %907 }
 0x56c   :  { %v910_v0 = vmul.f32 %v2922_v62, %v908_v63 }
 0x56e   :  { %912 = vrot.lane.b32.xlu1 %v910_v0, %s3052_s17 }
 0x5d8   :  { %v811_v2 = vpop.permute.xlu0 %810 }
 0x5d9   :  { %v813_v3 = vadd.f32 %v811_v2, %v3301_v11  ;;  %v917_v11 = vsub.f32 1.0, %v2922_v62 }
 0x5db   :  { %2923 = vtanh.f32 %v813_v3 }
 0x5e0   :  { %v913_v4 = vpop.permute.xlu1 %912 }
 0x5e1   :  { %v915_v5 = vadd.f32 %v913_v4, %v3338_v50  ;;  %v923_v50 = vmul.f32 %v2922_v62, %v3348_v32 }
 0x5e3   :  { %2925 = vtanh.f32 %v915_v5 }
 0x5e5   :  { %v2924_v6 = vpop.eup %2923 }
 0x5e6   :  { %817 = vrot.lane.b32.xlu0 %v2924_v6, %s3054_s8 }
 0x5ed   :  { %v2926_v8 = vpop.eup %2925 }
 0x5ee   :  { %919 = vrot.lane.b32.xlu1 %v2926_v8, %s3054_s8 }
 0x658   :  { %v818_v10 = vpop.permute.xlu0 %817 }
 0x659   :  { %v820_v13 = vmul.f32 %v818_v10, %v815_v9 }
 0x65b   :  { %v3382_v15 = vadd.f32 %v821_v12, %v820_v13 }
 0x65d   :  { %926 = vrot.lane.b32.xlu0 %v3382_v15, %s3054_s8 }
 0x660   :  { %v920_v18 = vpop.permute.xlu1 %919 }
 0x661   :  { %v922_v19 = vmul.f32 %v920_v18, %v917_v11 }
 0x663   :  { %v3387_v21 = vadd.f32 %v923_v50, %v922_v19 }
 0x665   :  { %1033 = vrot.lane.b32.xlu1 %v3387_v21, %s3054_s8  ;;  %932 = vst.msk [vmem:[#allocation2 + $0x30] sm:$0xff] %vm722_vm12, %v3387_v21 }
 0x6cf   :  { %v927_v22 = vpop.permute.xlu0 %926 }
 0x6d0   :  { %930 = vst.msk [vmem:[#allocation2 + $0x8] sm:$0xff] %vm247_vm10, %v927_v22  ;;  %2609 = vmatmul.mubr.msk.f32.vlgmr.msra.gmra.mrb[14].mxu1 %vm247_vm10, %v927_v22 }
 0x6d1   :  { %2817 = vmatpush3.bf16.msra.mxu1 %v3223_v53  ;;  %2630 = vmatprep.mubr.msk.f32.mxu1 %vm3053_vm11, %v3050_v29 }
 0x6d2   :  { %2818 = vmatprep.subr.bf16.mxu1 %v3051_v44 }
 0x6d5   :  { %2820 = vmatpush3.bf16.msra.mxu1 %v3234_v58 }
 0x6d6   :  { %2827 = vmatprep.subr.bf16.mxu1 %v3051_v44 }
 0x6d7   :  { %v1034_v23 = vpop.permute.xlu1 %1033 }
 0x6d8   :  { %2620 = vmatmul.mubr.msk.f32.vlgmr.msra.gmra.mrb[18].mxu0 %vm247_vm10, %v1034_v23 }
 0x6d9   :  { %2823 = vmatpush3.bf16.msra.mxu0 %v3254_v1  ;;  %2641 = vmatprep.mubr.msk.f32.mxu0 %vm3053_vm11, %v3050_v29 }
 0x6da   :  { %2824 = vmatprep.subr.bf16.mxu0 %v3051_v44 }
 0x6dd   :  { %2826 = vmatpush3.bf16.msra.mxu0 %v3267_v7 }
 0x6de   :  { %2833 = vmatprep.subr.bf16.mxu0 %v3051_v44 }
 0x7a3   :  { %v1001_v25 = vpop.f32.mrb[14].mxu1 }
 0x7a4   :  { %v1012_v27 = vadd.f32 %v1001_v25, %v3307_v17  ;;  %v2610_v31 = vpop.f32.mrb[15].mxu1  ;;  %v1005_v36 = vadd.f32 %v1001_v25, %v3305_v16 }
 0x7a6   :  { %1014 = vrot.lane.b32.xlu0 %v1012_v27, %s3052_s17  ;;  %v2337_v37 = vmul.f32 -1.442695, %v1005_v36 }
 0x7a8   :  { %2927 = vpow2.f32 %v2337_v37 }
 0x7ab   :  { %v1103_v32 = vpop.f32.mrb[18].mxu0 }
 0x7ac   :  { %v1114_v33 = vadd.f32 %v1103_v32, %v3319_v30  ;;  %v2621_v34 = vpop.f32.mrb[19].mxu0  ;;  %v1107_v39 = vadd.f32 %v1103_v32, %v3334_v45 }
 0x7ae   :  { %1116 = vrot.lane.b32.xlu1 %v1114_v33, %s3052_s17  ;;  %v2339_v41 = vmul.f32 -1.442695, %v1107_v39 }
 0x7b0   :  { %2929 = vpow2.f32 %v2339_v41 }
 0x7b2   :  { %v2928_v43 = vpop.eup %2927 }
 0x7b3   :  { %v1009_v46 = vadd.f32 1.0, %v2928_v43 }
 0x7b5   :  { %2931 = vrcp.f32 %v1009_v46 }
 0x7ba   :  { %v2930_v48 = vpop.eup %2929 }
 0x7bb   :  { %v1111_v49 = vadd.f32 1.0, %v2930_v48 }
 0x7bd   :  { %2933 = vrcp.f32 %v1111_v49 }
 0x7bf   :  { %v2932_v51 = vpop.eup %2931 }
 0x7c0   :  { %v1024_v2 = vsub.f32 1.0, %v2932_v51  ;;  %v1030_v4 = vmul.f32 %v2932_v51, %v3382_v15 }
 0x7c7   :  { %v2934_v55 = vpop.eup %2933 }
 0x818   :  { %v1015_v52 = vpop.permute.xlu0 %1014 }
 0x819   :  { %v1017_v54 = vmul.f32 %v2932_v51, %v1015_v52 }
 0x81b   :  { %1019 = vrot.lane.b32.xlu0 %v1017_v54, %s3052_s17 }
 0x820   :  { %v1117_v56 = vpop.permute.xlu1 %1116 }
 0x821   :  { %v1119_v57 = vmul.f32 %v2934_v55, %v1117_v56 }
 0x823   :  { %1121 = vrot.lane.b32.xlu1 %v1119_v57, %s3052_s17 }
 0x88d   :  { %v1020_v59 = vpop.permute.xlu0 %1019 }
 0x88e   :  { %v1022_v60 = vadd.f32 %v1020_v59, %v3305_v16  ;;  %v1126_v16 = vsub.f32 1.0, %v2934_v55 }
 0x890   :  { %2935 = vtanh.f32 %v1022_v60 }
 0x895   :  { %v1122_v61 = vpop.permute.xlu1 %1121 }
 0x896   :  { %v1124_v62 = vadd.f32 %v1122_v61, %v3334_v45  ;;  %v1132_v45 = vmul.f32 %v2934_v55, %v3387_v21 }
 0x898   :  { %2937 = vtanh.f32 %v1124_v62 }
 0x89a   :  { %v2936_v63 = vpop.eup %2935 }
 0x89b   :  { %1026 = vrot.lane.b32.xlu0 %v2936_v63, %s3054_s8 }
 0x8a2   :  { %v2938_v0 = vpop.eup %2937 }
 0x8a3   :  { %1128 = vrot.lane.b32.xlu1 %v2938_v0, %s3054_s8 }
 0x90d   :  { %v1027_v3 = vpop.permute.xlu0 %1026 }
 0x90e   :  { %v1029_v5 = vmul.f32 %v1027_v3, %v1024_v2 }
 0x910   :  { %v3421_v6 = vadd.f32 %v1030_v4, %v1029_v5 }
 0x912   :  { %1135 = vrot.lane.b32.xlu0 %v3421_v6, %s3054_s8 }
 0x915   :  { %v1129_v8 = vpop.permute.xlu1 %1128 }
 0x916   :  { %v1131_v9 = vmul.f32 %v1129_v8, %v1126_v16 }
 0x918   :  { %v3426_v10 = vadd.f32 %v1132_v45, %v1131_v9 }
 0x91a   :  { %1242 = vrot.lane.b32.xlu1 %v3426_v10, %s3054_s8  ;;  %1141 = vst.msk [vmem:[#allocation2 + $0x28] sm:$0xff] %vm722_vm12, %v3426_v10 }
 0x984   :  { %v1136_v12 = vpop.permute.xlu0 %1135 }
 0x985   :  { %1139 = vst.msk [vmem:[#allocation2 + $0x10] sm:$0xff] %vm247_vm10, %v1136_v12  ;;  %2631 = vmatmul.mubr.msk.f32.vlgmr.msra.gmra.mrb[16].mxu1 %vm247_vm10, %v1136_v12 }
 0x986   :  { %2829 = vmatpush3.bf16.msra.mxu1 %v3223_v53  ;;  %2652 = vmatprep.mubr.msk.f32.mxu1 %vm3053_vm11, %v3050_v29 }
 0x987   :  { %2830 = vmatprep.subr.bf16.mxu1 %v3051_v44 }
 0x98a   :  { %2832 = vmatpush3.bf16.msra.mxu1 %v3234_v58 }
 0x98b   :  { %2839 = vmatprep.subr.bf16.mxu1 %v3051_v44 }
 0x98c   :  { %v1243_v13 = vpop.permute.xlu1 %1242 }
 0x98d   :  { %2642 = vmatmul.mubr.msk.f32.vlgmr.msra.gmra.mrb[20].mxu0 %vm247_vm10, %v1243_v13 }
 0x98e   :  { %2835 = vmatpush3.bf16.msra.mxu0 %v3254_v1  ;;  %2663 = vmatprep.mubr.msk.f32.mxu0 %vm3053_vm11, %v3050_v29 }
 0x98f   :  { %2836 = vmatprep.subr.bf16.mxu0 %v3051_v44 }
 0x992   :  { %2838 = vmatpush3.bf16.msra.mxu0 %v3267_v7 }
 0x993   :  { %2845 = vmatprep.subr.bf16.mxu0 %v3051_v44 }
 0xa58   :  { %v1210_v15 = vpop.f32.mrb[16].mxu1 }
 0xa59   :  { %v1221_v11 = vadd.f32 %v1210_v15, %v3307_v17  ;;  %v2632_v18 = vpop.f32.mrb[17].mxu1  ;;  %v1214_v22 = vadd.f32 %v1210_v15, %v3303_v14 }
 0xa5b   :  { %1223 = vrot.lane.b32.xlu0 %v1221_v11, %s3052_s17  ;;  %v2341_v23 = vmul.f32 -1.442695, %v1214_v22 }
 0xa5d   :  { %2939 = vpow2.f32 %v2341_v23 }
 0xa60   :  { %v1312_v50 = vpop.f32.mrb[20].mxu0 }
 0xa61   :  { %v1323_v19 = vadd.f32 %v1312_v50, %v3319_v30  ;;  %v2643_v21 = vpop.f32.mrb[21].mxu0  ;;  %v1316_v25 = vadd.f32 %v1312_v50, %v3336_v47 }
 0xa63   :  { %1325 = vrot.lane.b32.xlu1 %v1323_v19, %s3052_s17  ;;  %v2343_v27 = vmul.f32 -1.442695, %v1316_v25 }
 0xa65   :  { %2941 = vpow2.f32 %v2343_v27 }
 0xa67   :  { %v2940_v31 = vpop.eup %2939 }
 0xa68   :  { %v1218_v32 = vadd.f32 1.0, %v2940_v31 }
 0xa6a   :  { %2943 = vrcp.f32 %v1218_v32 }
 0xa6f   :  { %v2942_v33 = vpop.eup %2941 }
 0xa70   :  { %v1320_v34 = vadd.f32 1.0, %v2942_v33 }
 0xa72   :  { %2945 = vrcp.f32 %v1320_v34 }
 0xa74   :  { %v2944_v36 = vpop.eup %2943 }
 0xa75   :  { %v1233_v56 = vsub.f32 1.0, %v2944_v36  ;;  %v1239_v59 = vmul.f32 %v2944_v36, %v3421_v6 }
 0xa7c   :  { %v2946_v41 = vpop.eup %2945 }
 0xacd   :  { %v1224_v37 = vpop.permute.xlu0 %1223 }
 0xace   :  { %v1226_v39 = vmul.f32 %v2944_v36, %v1224_v37 }
 0xad0   :  { %1228 = vrot.lane.b32.xlu0 %v1226_v39, %s3052_s17 }
 0xad5   :  { %v1326_v43 = vpop.permute.xlu1 %1325 }
 0xad6   :  { %v1328_v46 = vmul.f32 %v2946_v41, %v1326_v43 }
 0xad8   :  { %1330 = vrot.lane.b32.xlu1 %v1328_v46, %s3052_s17 }
 0xb42   :  { %v1229_v48 = vpop.permute.xlu0 %1228 }
 0xb43   :  { %v1231_v49 = vadd.f32 %v1229_v48, %v3303_v14  ;;  %v1335_v14 = vsub.f32 1.0, %v2946_v41 }
 0xb45   :  { %2947 = vtanh.f32 %v1231_v49 }
 0xb4a   :  { %v1331_v51 = vpop.permute.xlu1 %1330 }
 0xb4b   :  { %v1333_v52 = vadd.f32 %v1331_v51, %v3336_v47  ;;  %v1341_v47 = vmul.f32 %v2946_v41, %v3426_v10 }
 0xb4d   :  { %2949 = vtanh.f32 %v1333_v52 }
 0xb4f   :  { %v2948_v54 = vpop.eup %2947 }
 0xb50   :  { %1235 = vrot.lane.b32.xlu0 %v2948_v54, %s3054_s8 }
 0xb57   :  { %v2950_v55 = vpop.eup %2949 }
 0xb58   :  { %1337 = vrot.lane.b32.xlu1 %v2950_v55, %s3054_s8 }
 0xbc2   :  { %v1236_v57 = vpop.permute.xlu0 %1235 }
 0xbc3   :  { %v1238_v60 = vmul.f32 %v1236_v57, %v1233_v56 }
 0xbc5   :  { %v3460_v61 = vadd.f32 %v1239_v59, %v1238_v60 }
 0xbc7   :  { %1344 = vrot.lane.b32.xlu0 %v3460_v61, %s3054_s8 }
 0xbca   :  { %v1338_v62 = vpop.permute.xlu1 %1337 }
 0xbcb   :  { %v1340_v63 = vmul.f32 %v1338_v62, %v1335_v14 }
 0xbcd   :  { %v3465_v0 = vadd.f32 %v1341_v47, %v1340_v63 }
 0xbcf   :  { %1451 = vrot.lane.b32.xlu1 %v3465_v0, %s3054_s8  ;;  %1350 = vst.msk [vmem:[#allocation2 + $0x20] sm:$0xff] %vm722_vm12, %v3465_v0 }
 0xc39   :  { %v1345_v2 = vpop.permute.xlu0 %1344 }
 0xc3a   :  { %1348 = vst.msk [vmem:[#allocation2 + $0x18] sm:$0xff] %vm247_vm10, %v1345_v2  ;;  %2653 = vmatmul.mubr.msk.f32.vlgmr.msra.gmra.mrb[18].mxu1 %vm247_vm10, %v1345_v2 }
 0xc3b   :  { %2841 = vmatpush3.bf16.msra.mxu1 %v3223_v53  ;;  %2674 = vmatprep.mubr.msk.f32.mxu1 %vm3053_vm11, %v3050_v29 }
 0xc3c   :  { %2842 = vmatprep.subr.bf16.mxu1 %v3051_v44 }
 0xc3f   :  { %2844 = vmatpush3.bf16.msra.mxu1 %v3234_v58 }
 0xc40   :  { %2851 = vmatprep.subr.bf16.mxu1 %v3051_v44 }
 0xc41   :  { %v1452_v3 = vpop.permute.xlu1 %1451 }
 0xc42   :  { %2664 = vmatmul.mubr.msk.f32.vlgmr.msra.gmra.mrb[22].mxu0 %vm247_vm10, %v1452_v3 }
 0xc43   :  { %2847 = vmatpush3.bf16.msra.mxu0 %v3254_v1  ;;  %2685 = vmatprep.mubr.msk.f32.mxu0 %vm3053_vm11, %v3050_v29 }
 0xc44   :  { %2848 = vmatprep.subr.bf16.mxu0 %v3051_v44 }
 0xc47   :  { %2850 = vmatpush3.bf16.msra.mxu0 %v3267_v7 }
 0xc48   :  { %2857 = vmatprep.subr.bf16.mxu0 %v3051_v44 }
 0xd0d   :  { %v1419_v4 = vpop.f32.mrb[18].mxu1 }
 0xd0e   :  { %v1430_v5 = vadd.f32 %v1419_v4, %v3307_v17  ;;  %v2654_v6 = vpop.f32.mrb[19].mxu1  ;;  %v1423_v9 = vadd.f32 %v1419_v4, %v3312_v24 }
 0xd10   :  { %1432 = vrot.lane.b32.xlu0 %v1430_v5, %s3052_s17  ;;  %v2345_v10 = vmul.f32 -1.442695, %v1423_v9 }
 0xd12   :  { %2951 = vpow2.f32 %v2345_v10 }
 0xd15   :  { %v1521_v16 = vpop.f32.mrb[22].mxu0 }
 0xd16   :  { %v1532_v8 = vadd.f32 %v1521_v16, %v3319_v30  ;;  %v2665_v45 = vpop.f32.mrb[23].mxu0  ;;  %v1525_v12 = vadd.f32 %v1521_v16, %v3330_v40 }
 0xd18   :  { %1534 = vrot.lane.b32.xlu1 %v1532_v8, %s3052_s17  ;;  %v2347_v13 = vmul.f32 -1.442695, %v1525_v12 }
 0xd1a   :  { %2953 = vpow2.f32 %v2347_v13 }
 0xd1c   :  { %v2952_v15 = vpop.eup %2951 }
 0xd1d   :  { %v1427_v11 = vadd.f32 1.0, %v2952_v15 }
 0xd1f   :  { %2955 = vrcp.f32 %v1427_v11 }
 0xd24   :  { %v2954_v18 = vpop.eup %2953 }
 0xd25   :  { %v1529_v50 = vadd.f32 1.0, %v2954_v18 }
 0xd27   :  { %2957 = vrcp.f32 %v1529_v50 }
 0xd29   :  { %v2956_v19 = vpop.eup %2955 }
 0xd2a   :  { %v1442_v39 = vsub.f32 1.0, %v2956_v19  ;;  %v1448_v43 = vmul.f32 %v2956_v19, %v3460_v61 }
 0xd31   :  { %v2958_v23 = vpop.eup %2957 }
 0xd82   :  { %v1433_v21 = vpop.permute.xlu0 %1432 }
 0xd83   :  { %v1435_v22 = vmul.f32 %v2956_v19, %v1433_v21 }
 0xd85   :  { %1437 = vrot.lane.b32.xlu0 %v1435_v22, %s3052_s17 }
 0xd8a   :  { %v1535_v25 = vpop.permute.xlu1 %1534 }
 0xd8b   :  { %v1537_v27 = vmul.f32 %v2958_v23, %v1535_v25 }
 0xd8d   :  { %1539 = vrot.lane.b32.xlu1 %v1537_v27, %s3052_s17 }
 0xdf7   :  { %v1438_v31 = vpop.permute.xlu0 %1437 }
 0xdf8   :  { %v1440_v32 = vadd.f32 %v1438_v31, %v3312_v24  ;;  %v1544_v24 = vsub.f32 1.0, %v2958_v23 }
 0xdfa   :  { %2959 = vtanh.f32 %v1440_v32 }
 0xdff   :  { %v1540_v33 = vpop.permute.xlu1 %1539 }
 0xe00   :  { %v1542_v34 = vadd.f32 %v1540_v33, %v3330_v40  ;;  %v1550_v40 = vmul.f32 %v2958_v23, %v3465_v0 }
 0xe02   :  { %2961 = vtanh.f32 %v1542_v34 }
 0xe04   :  { %v2960_v36 = vpop.eup %2959 }
 0xe05   :  { %1444 = vrot.lane.b32.xlu0 %v2960_v36, %s3054_s8 }
 0xe0c   :  { %v2962_v37 = vpop.eup %2961 }
 0xe0d   :  { %1546 = vrot.lane.b32.xlu1 %v2962_v37, %s3054_s8 }
 0xe77   :  { %v1445_v41 = vpop.permute.xlu0 %1444 }
 0xe78   :  { %v1447_v46 = vmul.f32 %v1445_v41, %v1442_v39 }
 0xe7a   :  { %v3499_v48 = vadd.f32 %v1448_v43, %v1447_v46 }
 0xe7c   :  { %1553 = vrot.lane.b32.xlu0 %v3499_v48, %s3054_s8 }
 0xe7f   :  { %v1547_v49 = vpop.permute.xlu1 %1546 }
 0xe80   :  { %v1549_v51 = vmul.f32 %v1547_v49, %v1544_v24 }
 0xe82   :  { %v3504_v52 = vadd.f32 %v1550_v40, %v1549_v51 }
 0xe84   :  { %1557 = vst.msk [vmem:[#allocation2 + $0x18] sm:$0xff] %vm722_vm12, %v3504_v52  ;;  %1658 = vrot.lane.b32.xlu1 %v3504_v52, %s3054_s8 }
 0xeee   :  { %v1554_v54 = vpop.permute.xlu0 %1553 }
 0xeef   :  { %1556 = vst.msk [vmem:[#allocation2 + $0x20] sm:$0xff] %vm247_vm10, %v1554_v54  ;;  %2675 = vmatmul.mubr.msk.f32.vlgmr.msra.gmra.mrb[20].mxu1 %vm247_vm10, %v1554_v54 }
 0xef0   :  { %2853 = vmatpush3.bf16.msra.mxu1 %v3223_v53  ;;  %2696 = vmatprep.mubr.msk.f32.mxu1 %vm3053_vm11, %v3050_v29 }
 0xef1   :  { %2854 = vmatprep.subr.bf16.mxu1 %v3051_v44 }
 0xef4   :  { %2856 = vmatpush3.bf16.msra.mxu1 %v3234_v58 }
 0xef5   :  { %2863 = vmatprep.subr.bf16.mxu1 %v3051_v44 }
 0xef6   :  { %v1659_v55 = vpop.permute.xlu1 %1658 }
 0xef7   :  { %2686 = vmatmul.mubr.msk.f32.vlgmr.msra.gmra.mrb[24].mxu0 %vm247_vm10, %v1659_v55 }
 0xef8   :  { %2859 = vmatpush3.bf16.msra.mxu0 %v3254_v1  ;;  %2707 = vmatprep.mubr.msk.f32.mxu0 %vm3053_vm11, %v3050_v29 }
 0xef9   :  { %2860 = vmatprep.subr.bf16.mxu0 %v3051_v44 }
 0xefc   :  { %2862 = vmatpush3.bf16.msra.mxu0 %v3267_v7 }
 0xefd   :  { %2869 = vmatprep.subr.bf16.mxu0 %v3051_v44 }
 0xfc2   :  { %v1626_v56 = vpop.f32.mrb[20].mxu1 }
 0xfc3   :  { %v1637_v57 = vadd.f32 %v1626_v56, %v3307_v17  ;;  %v2676_v59 = vpop.f32.mrb[21].mxu1  ;;  %v1630_v62 = vadd.f32 %v1626_v56, %v3309_v20 }
 0xfc5   :  { %1639 = vrot.lane.b32.xlu0 %v1637_v57, %s3052_s17  ;;  %v2349_v47 = vmul.f32 -1.442695, %v1630_v62 }
 0xfc7   :  { %2963 = vpow2.f32 %v2349_v47 }
 0xfca   :  { %v1728_v60 = vpop.f32.mrb[24].mxu0 }
 0xfcb   :  { %v1739_v61 = vadd.f32 %v1728_v60, %v3319_v30  ;;  %v2687_v14 = vpop.f32.mrb[25].mxu0  ;;  %v1732_v63 = vadd.f32 %v1728_v60, %v3332_v42 }
 0xfcd   :  { %1741 = vrot.lane.b32.xlu1 %v1739_v61, %s3052_s17  ;;  %v2351_v0 = vmul.f32 -1.442695, %v1732_v63 }
 0xfcf   :  { %2965 = vpow2.f32 %v2351_v0 }
 0xfd1   :  { %v2964_v2 = vpop.eup %2963 }
 0xfd2   :  { %v1634_v3 = vadd.f32 1.0, %v2964_v2 }
 0xfd4   :  { %2967 = vrcp.f32 %v1634_v3 }
 0xfd9   :  { %v2966_v4 = vpop.eup %2965 }
 0xfda   :  { %v1736_v5 = vadd.f32 1.0, %v2966_v4 }
 0xfdc   :  { %2969 = vrcp.f32 %v1736_v5 }
 0xfde   :  { %v2968_v6 = vpop.eup %2967 }
 0xfdf   :  { %v1649_v19 = vsub.f32 1.0, %v2968_v6  ;;  %v1655_v22 = vmul.f32 %v2968_v6, %v3499_v48 }
 0xfe6   :  { %v2970_v45 = vpop.eup %2969 }
0x1037   :  { %v1640_v16 = vpop.permute.xlu0 %1639 }
0x1038   :  { %v1642_v8 = vmul.f32 %v2968_v6, %v1640_v16 }
0x103a   :  { %1644 = vrot.lane.b32.xlu0 %v1642_v8, %s3052_s17 }
0x103f   :  { %v1742_v9 = vpop.permute.xlu1 %1741 }
0x1040   :  { %v1744_v10 = vmul.f32 %v2970_v45, %v1742_v9 }
0x1042   :  { %1746 = vrot.lane.b32.xlu1 %v1744_v10, %s3052_s17 }
0x10ac   :  { %v1645_v12 = vpop.permute.xlu0 %1644 }
0x10ad   :  { %v1647_v13 = vadd.f32 %v1645_v12, %v3309_v20  ;;  %v1751_v20 = vsub.f32 1.0, %v2970_v45 }
0x10af   :  { %2971 = vtanh.f32 %v1647_v13 }
0x10b4   :  { %v1747_v15 = vpop.permute.xlu1 %1746 }
0x10b5   :  { %v1749_v11 = vadd.f32 %v1747_v15, %v3332_v42  ;;  %v1757_v42 = vmul.f32 %v2970_v45, %v3504_v52 }
0x10b7   :  { %2973 = vtanh.f32 %v1749_v11 }
0x10b9   :  { %v2972_v18 = vpop.eup %2971 }
0x10ba   :  { %1651 = vrot.lane.b32.xlu0 %v2972_v18, %s3054_s8 }
0x10c1   :  { %v2974_v50 = vpop.eup %2973 }
0x10c2   :  { %1753 = vrot.lane.b32.xlu1 %v2974_v50, %s3054_s8 }
0x112c   :  { %v1652_v21 = vpop.permute.xlu0 %1651 }
0x112d   :  { %v1654_v23 = vmul.f32 %v1652_v21, %v1649_v19 }
0x112f   :  { %v3538_v25 = vadd.f32 %v1655_v22, %v1654_v23 }
0x1131   :  { %1760 = vrot.lane.b32.xlu0 %v3538_v25, %s3054_s8 }
0x1134   :  { %v1754_v27 = vpop.permute.xlu1 %1753 }
0x1135   :  { %v1756_v31 = vmul.f32 %v1754_v27, %v1751_v20 }
0x1137   :  { %v3543_v32 = vadd.f32 %v1757_v42, %v1756_v31 }
0x1139   :  { %1764 = vst.msk [vmem:[#allocation2 + $0x10] sm:$0xff] %vm722_vm12, %v3543_v32  ;;  %1865 = vrot.lane.b32.xlu1 %v3543_v32, %s3054_s8 }
0x11a3   :  { %v1761_v33 = vpop.permute.xlu0 %1760 }
0x11a4   :  { %1763 = vst.msk [vmem:[#allocation2 + $0x28] sm:$0xff] %vm247_vm10, %v1761_v33  ;;  %2697 = vmatmul.mubr.msk.f32.vlgmr.msra.gmra.mrb[22].mxu1 %vm247_vm10, %v1761_v33 }
0x11a5   :  { %2865 = vmatpush3.bf16.msra.mxu1 %v3223_v53  ;;  %2718 = vmatprep.mubr.msk.f32.mxu1 %vm3053_vm11, %v3050_v29 }
0x11a6   :  { %2866 = vmatprep.subr.bf16.mxu1 %v3051_v44 }
0x11a9   :  { %2868 = vmatpush3.bf16.msra.mxu1 %v3234_v58 }
0x11aa   :  { %2875 = vmatprep.subr.bf16.mxu1 %v3051_v44 }
0x11ab   :  { %v1866_v34 = vpop.permute.xlu1 %1865 }
0x11ac   :  { %2708 = vmatmul.mubr.msk.f32.vlgmr.msra.gmra.mrb[26].mxu0 %vm247_vm10, %v1866_v34 }
0x11ad   :  { %2871 = vmatpush3.bf16.msra.mxu0 %v3254_v1  ;;  %2729 = vmatprep.mubr.msk.f32.mxu0 %vm3053_vm11, %v3050_v29 }
0x11ae   :  { %2872 = vmatprep.subr.bf16.mxu0 %v3051_v44 }
0x11b1   :  { %2874 = vmatpush3.bf16.msra.mxu0 %v3267_v7 }
0x1277   :  { %v1833_v53 = vpop.f32.mrb[22].mxu1 }
0x1278   :  { %v1844_v36 = vadd.f32 %v1833_v53, %v3307_v17  ;;  %v2698_v37 = vpop.f32.mrb[23].mxu1  ;;  %v1837_v1 = vadd.f32 %v1833_v53, %v3317_v28 }
0x1279   :  { %v2180_v37 = vld [vmem:[%s3675_s10] sm:$0xff] }
0x127a   :  { %1846 = vrot.lane.b32.xlu0 %v1844_v36, %s3052_s17  ;;  %v2353_v43 = vmul.f32 -1.442695, %v1837_v1  ;;  %v2184_v1 = vld [vmem:[%s3675_s10 + $0x20] sm:$0xff] }
0x127c   :  { %2975 = vpow2.f32 %v2353_v43  ;;  %v2185_v43 = vld [vmem:[%s3675_s10 + $0x28] sm:$0xff] }
0x127f   :  { %v1935_v58 = vpop.f32.mrb[26].mxu0 }
0x1280   :  { %v1946_v39 = vadd.f32 %v1935_v58, %v3319_v30  ;;  %v2709_v41 = vpop.f32.mrb[27].mxu0  ;;  %v1939_v46 = vadd.f32 %v1935_v58, %v3325_v35  ;;  %v2181_v58 = vld [vmem:[%s3675_s10 + $0x8] sm:$0xff] }
0x1282   :  { %1948 = vrot.lane.b32.xlu1 %v1946_v39, %s3052_s17  ;;  %v2355_v48 = vmul.f32 -1.442695, %v1939_v46  ;;  %v2182_v39 = vld [vmem:[%s3675_s10 + $0x10] sm:$0xff]  ;;  %v2882_v46 = vpack.c.bf16 %v2185_v43, %v2184_v1 }
0x1284   :  { %2977 = vpow2.f32 %v2355_v48 }
0x1286   :  { %v2976_v7 = vpop.eup %2975 }
0x1287   :  { %v1841_v24 = vadd.f32 1.0, %v2976_v7  ;;  %v2186_v7 = vld [vmem:[%s3675_s10 + $0x30] sm:$0xff] }
0x1289   :  { %2979 = vrcp.f32 %v1841_v24  ;;  %v2187_v24 = vld [vmem:[%s3675_s10 + $0x38] sm:$0xff] }
0x128e   :  { %v2978_v49 = vpop.eup %2977 }
0x128f   :  { %v1943_v40 = vadd.f32 1.0, %v2978_v49  ;;  %v2885_v49 = vpack.c.bf16 %v2187_v24, %v2186_v7 }
0x1291   :  { %2981 = vrcp.f32 %v1943_v40 }
0x1293   :  { %v2980_v51 = vpop.eup %2979 }
0x1294   :  { %v1856_v63 = vsub.f32 1.0, %v2980_v51  ;;  %v1862_v2 = vmul.f32 %v2980_v51, %v3538_v25 }
0x129b   :  { %v2982_v55 = vpop.eup %2981 }
0x12ec   :  { %v1847_v52 = vpop.permute.xlu0 %1846 }
0x12ed   :  { %v1849_v54 = vmul.f32 %v2980_v51, %v1847_v52 }
0x12ef   :  { %1851 = vrot.lane.b32.xlu0 %v1849_v54, %s3052_s17 }
0x12f4   :  { %v1949_v56 = vpop.permute.xlu1 %1948 }
0x12f5   :  { %v1951_v57 = vmul.f32 %v2982_v55, %v1949_v56 }
0x12f7   :  { %1953 = vrot.lane.b32.xlu1 %v1951_v57, %s3052_s17 }
0x1361   :  { %v1852_v59 = vpop.permute.xlu0 %1851 }
0x1362   :  { %v1854_v60 = vadd.f32 %v1852_v59, %v3317_v28  ;;  %v1958_v28 = vsub.f32 1.0, %v2982_v55 }
0x1364   :  { %2983 = vtanh.f32 %v1854_v60 }
0x1369   :  { %v1954_v61 = vpop.permute.xlu1 %1953 }
0x136a   :  { %v1956_v14 = vadd.f32 %v1954_v61, %v3325_v35  ;;  %v1964_v35 = vmul.f32 %v2982_v55, %v3543_v32 }
0x136c   :  { %2985 = vtanh.f32 %v1956_v14 }
0x136e   :  { %v2984_v62 = vpop.eup %2983 }
0x136f   :  { %1858 = vrot.lane.b32.xlu0 %v2984_v62, %s3054_s8 }
0x1376   :  { %v2986_v47 = vpop.eup %2985 }
0x1377   :  { %1960 = vrot.lane.b32.xlu1 %v2986_v47, %s3054_s8 }
0x13e1   :  { %v1859_v0 = vpop.permute.xlu0 %1858 }
0x13e2   :  { %v1861_v3 = vmul.f32 %v1859_v0, %v1856_v63 }
0x13e4   :  { %v3576_v4 = vadd.f32 %v1862_v2, %v1861_v3 }
0x13e6   :  { %1967 = vrot.lane.b32.xlu0 %v3576_v4, %s3054_s8 }
0x13e9   :  { %v1961_v5 = vpop.permute.xlu1 %1960 }
0x13ea   :  { %v1963_v6 = vmul.f32 %v1961_v5, %v1958_v28 }
0x13ec   :  { %v3581_v16 = vadd.f32 %v1964_v35, %v1963_v6 }
0x13ee   :  { %1971 = vst.msk [vmem:[#allocation2 + $0x8] sm:$0xff] %vm722_vm12, %v3581_v16  ;;  %2072 = vrot.lane.b32.xlu1 %v3581_v16, %s3054_s8 }
0x1458   :  { %v1968_v8 = vpop.permute.xlu0 %1967 }
0x1459   :  { %1970 = vst.msk [vmem:[#allocation2 + $0x30] sm:$0xff] %vm247_vm10, %v1968_v8  ;;  %2719 = vmatmul.mubr.msk.f32.vlgmr.msra.gmra.mrb[24].mxu1 %vm247_vm10, %v1968_v8 }
0x145a   :  { %2748 = vmatprep.mubr.msk.f32.mxu1 %vm3053_vm11, %v3050_v29 }
0x1460   :  { %v2073_v45 = vpop.permute.xlu1 %2072 }
0x1461   :  { %2730 = vmatmul.mubr.msk.f32.vlgmr.msra.gmra.mrb[28].mxu0 %vm247_vm10, %v2073_v45 }
0x152c   :  { %v2040_v9 = vpop.f32.mrb[24].mxu1 }
0x152d   :  { %v2051_v10 = vadd.f32 %v2040_v9, %v3307_v17  ;;  %v2720_v12 = vpop.f32.mrb[25].mxu1  ;;  %v2044_v18 = vadd.f32 %v2040_v9, %v3315_v26 }
0x152f   :  { %2053 = vrot.lane.b32.xlu0 %v2051_v10, %s3052_s17  ;;  %v2357_v50 = vmul.f32 -1.442695, %v2044_v18 }
0x1531   :  { %2987 = vpow2.f32 %v2357_v50 }
0x1534   :  { %v2142_v13 = vpop.f32.mrb[28].mxu0 }
0x1535   :  { %v2153_v15 = vadd.f32 %v2142_v13, %v3319_v30  ;;  %v2731_v11 = vpop.f32.mrb[29].mxu0  ;;  %v2146_v29 = vadd.f32 %v2142_v13, %v3327_v38 }
0x1537   :  { %2155 = vrot.lane.b32.xlu1 %v2153_v15, %s3052_s17  ;;  %v2359_v19 = vmul.f32 -1.442695, %v2146_v29 }
0x1539   :  { %2989 = vpow2.f32 %v2359_v19 }
0x153b   :  { %v2988_v21 = vpop.eup %2987 }
0x153c   :  { %v2048_v22 = vadd.f32 1.0, %v2988_v21 }
0x153e   :  { %2991 = vrcp.f32 %v2048_v22 }
0x1543   :  { %v2990_v17 = vpop.eup %2989 }
0x1544   :  { %v2150_v23 = vadd.f32 1.0, %v2990_v17 }
0x1546   :  { %2993 = vrcp.f32 %v2150_v23 }
0x1548   :  { %v2992_v25 = vpop.eup %2991 }
0x1549   :  { %v2063_v40 = vsub.f32 1.0, %v2992_v25  ;;  %v2069_v52 = vmul.f32 %v2992_v25, %v3576_v4 }
0x1550   :  { %v2994_v27 = vpop.eup %2993 }
0x1551   :  { %v2165_v56 = vsub.f32 1.0, %v2994_v27  ;;  %v2171_v59 = vmul.f32 %v2994_v27, %v3581_v16 }
0x15a1   :  { %v2054_v20 = vpop.permute.xlu0 %2053 }
0x15a2   :  { %v2056_v30 = vmul.f32 %v2992_v25, %v2054_v20 }
0x15a4   :  { %2058 = vrot.lane.b32.xlu0 %v2056_v30, %s3052_s17 }
0x15a9   :  { %v2156_v42 = vpop.permute.xlu1 %2155 }
0x15aa   :  { %v2158_v31 = vmul.f32 %v2994_v27, %v2156_v42 }
0x15ac   :  { %2160 = vrot.lane.b32.xlu1 %v2158_v31, %s3052_s17 }
0x1616   :  { %v2059_v32 = vpop.permute.xlu0 %2058 }
0x1617   :  { %v2061_v33 = vadd.f32 %v2059_v32, %v3315_v26  ;;  %v2876_v26 = vpack.c.bf16 %v2181_v58, %v2180_v37 }
0x1619   :  { %2995 = vtanh.f32 %v2061_v33  ;;  %2877 = vmatpush3.bf16.msra.mxu1 %v2876_v26 }
0x161a   :  { %2878 = vmatprep.subr.bf16.mxu1 %v3051_v44 }
0x161e   :  { %v2161_v34 = vpop.permute.xlu1 %2160 }
0x161f   :  { %v2163_v53 = vadd.f32 %v2161_v34, %v3327_v38  ;;  %v2183_v38 = vld [vmem:[%s3675_s10 + $0x18] sm:$0xff]  ;;  %s3055_s10 = smov [#allocation2]  }
0x1620   :  { %v2879_v41 = vpack.c.bf16 %v2183_v38, %v2182_v39  ;;  %s2276_s1 = sshll.u32 %s3055_s10, 4  ;;  %s2277_s1 = int_to_ptr.vmem [resolvable:$true] %s2276_s1 }
0x1621   :  { %2997 = vtanh.f32 %v2163_v53  ;;  %s3001_s2 = scalar_lea.vmem %s2277_s1, 1024  ;;  %p3006_p1 = scmp.lt.s32.totalorder %s2277_s1, %s2277_s1 }
0x1622   :  { %2880 = vmatpush3.bf16.msra.mxu1 %v2879_v41  ;;  %p3002_p0 = scmp.ne.s32.totalorder %s2277_s1, %s3001_s2  ;;  %p3007_p2 = scmp.lt.s32.totalorder %s3001_s2, %s3001_s2 }
0x1623   :  { %v2996_v36 = vpop.eup %2995  ;;  %2881 = vmatprep.subr.bf16.mxu1 %v3051_v44 }
0x1624   :  { %2065 = vrot.lane.b32.xlu0 %v2996_v36, %s3054_s8  ;;  %p3008_p3 = por %p3007_p2, %p3006_p1 }
0x1626   :  { %2883 = vmatpush3.bf16.msra.mxu1 %v2882_v46  ;;  %p3009_p4 = pnand %p3008_p3, %p3002_p0 }
0x1627   :  { %2884 = vmatprep.subr.bf16.mxu1 %v3051_v44 }
0x162a   :  { %2886 = vmatpush3.bf16.msra.mxu1 %v2885_v49 }
0x162b   :  { %v2998_v48 = vpop.eup %2997 }
0x162c   :  { %2167 = vrot.lane.b32.xlu1 %v2998_v48, %s3054_s8 }
0x1696   :  { %v2066_v51 = vpop.permute.xlu0 %2065 }
0x1697   :  { %v2068_v54 = vmul.f32 %v2066_v51, %v2063_v40 }
0x1699   :  { %v2070_v55 = vadd.f32 %v2069_v52, %v2068_v54 }
0x169b   :  { %2174 = vrot.lane.b32.xlu0 %v2070_v55, %s3054_s8 }
0x169e   :  { %v2168_v57 = vpop.permute.xlu1 %2167 }
0x169f   :  { %v2170_v60 = vmul.f32 %v2168_v57, %v2165_v56 }
0x16a1   :  { %v2172_v61 = vadd.f32 %v2171_v59, %v2170_v60 }
0x16a3   :  { %2178 = vst.msk [vmem:[#allocation2] sm:$0xff] %vm722_vm12, %v2172_v61 }
0x170d   :  { %v2175_v14 = vpop.permute.xlu0 %2174 }
0x170e   :  { %2177 = vst.msk [vmem:[#allocation2 + $0x38] sm:$0xff] %vm247_vm10, %v2175_v14  ;;  %v2179_v44 = vsel %vm247_vm10, %v2175_v14, %v2172_v61 }
0x170f   :  { %2749 = vmatmul.mubr.msk.f32.vlgmr.msra.gmra.mrb[26].mxu1 %vm2195_vm13, %v2179_v44 }
0x1710   :  { %3012 = shalt.err (!%p3009_p4)
}
0x1711   :  { %s3013_s6 = scalar_lea.hbm %s3677_s12, 1024 }
0x1712   :  { %p3014_p5 = scmp.ne.s32.totalorder %s3677_s12, %s3013_s6  ;;  %p3017_p6 = scmp.lt.u32.totalorder %s3013_s6, %s3677_s12 }
0x1714   :  { %p3019_p7 = pnand %p3017_p6, %p3014_p5 }
0x1716   :  { %3022 = shalt.err (!%p3019_p7)
}
0x1717   :  { %s3056_s15 = smov 128   ;;  %s3057_s8 = smov 8   ;;  %v2360_v62 = vld [vmem:[%s3676_s11] ss:$0 sm:$0xff] }
0x1718   :  { %2282 = dma.vmem_to_hbm [thread:$0]  %s2277_s1, 1024, %s3677_s12, [#allocation3], %s3056_s15, %s3056_s15, %s3057_s8  }
0x1719   :  { %s3058_s21 = smov [#allocation4]  }
0x171a   :  { %s2289_s5 = sshll.u32 %s3058_s21, 4  ;;  %s2290_s5 = int_to_ptr.vmem [resolvable:$true] %s2289_s5 }
0x171b   :  { %s3023_s17 = scalar_lea.vmem %s2290_s5, 128  ;;  %p3028_p9 = scmp.lt.s32.totalorder %s2290_s5, %s2290_s5 }
0x171c   :  { %p3024_p8 = scmp.ne.s32.totalorder %s2290_s5, %s3023_s17  ;;  %p3029_p10 = scmp.lt.s32.totalorder %s3023_s17, %s3023_s17 }
0x171e   :  { %p3030_p11 = por %p3029_p10, %p3028_p9 }
0x1720   :  { %p3031_p12 = pnand %p3030_p11, %p3024_p8 }
0x17e2   :  { %v2265_v47 = vpop.f32.mrb[26].mxu1 }
0x17e3   :  { %v2266_v63 = vadd.f32 %v2360_v62, %v2265_v47  ;;  %v2750_v0 = vpop.f32.mrb[27].mxu1 }
0x17e5   :  { %2999 = vtanh.f32 %v2266_v63 }
0x17ef   :  { %v3000_v2 = vpop.eup %2999 }
0x17f0   :  { %2270 = vst.msk [vmem:[#allocation4] sm:$0xff] %vm247_vm10, %v3000_v2 }
0x17f1   :  { %3034 = shalt.err (!%p3031_p12)
}
0x17f2   :  { %s3035_s11 = scalar_lea.hbm %s3678_s13, 128 }
0x17f3   :  { %p3036_p13 = scmp.ne.s32.totalorder %s3678_s13, %s3035_s11  ;;  %p3039_p0 = scmp.lt.u32.totalorder %s3035_s11, %s3678_s13 }
0x17f5   :  { %p3041_p1 = pnand %p3039_p0, %p3036_p13 }
0x17f7   :  { %3044 = shalt.err (!%p3041_p1)
}
0x17f8   :  { %2292 = dma.vmem_to_hbm [thread:$0]  %s2290_s5, 128, %s3678_s13, [#allocation5]  }
0x17f9   :  { %3045 = dma.done.wait [#allocation3], 1024  }
0x17fa   :  { %3046 = vsyncadd [#allocation3], 4294966272 }
0x17fb   :  { %3047 = dma.done.wait [#allocation5], 128  }
0x17fc   :  { %3048 = vsyncadd [#allocation5], 4294967168 }
0x17fd   :  { %2299 = vsyncpa [#allocation3], 1 }
0x17fe   :  { %2300 = vsyncpa [#allocation5], 1 }

</bundles_post_ra>
